<compile_context>
chip_gen: v6e
topology: v6e:2x2x1
jax: 0.10.0
libtpu: 0.0.40
codegen_flags: <defaults>
</compile_context>

<pallas_src>
import jax
import jax.numpy as jnp
from jax.experimental import pallas as pl
from jax.experimental.pallas import tpu as pltpu


LN_EPS = 1e-5  # PyTorch nn.LayerNorm default


def _round_up(n, m):
    return ((n + m - 1) // m) * m


def _pad2(a, rows, cols):
    return jnp.pad(a, ((0, rows - a.shape[0]), (0, cols - a.shape[1])))


# ---------------------------------------------------------------------------
# Parameters (PyTorch layout) + pure-JAX reference
# ---------------------------------------------------------------------------
def init_autoencoder_params(key, input_dim, hidden_dim, output_dim,
                            dtype=jnp.float32):
    """8 layers in forward order: (W(out,in), b, gamma|None, beta|None);
    gamma/beta present iff the layer is followed by a LayerNorm."""
    hd, hd2, hd4 = hidden_dim, 2 * hidden_dim, 4 * hidden_dim
    layer_shapes = [
        (input_dim, hd, True),    # enc fc1 + ln1
        (hd, hd2, True),          # enc fc2 + ln2
        (hd2, hd4, True),         # enc fc3 + ln3
        (hd4, hd4, False),        # enc fc4 (relu only)
        (hd4, hd4, True),         # dec fc1 + ln1
        (hd4, hd2, True),         # dec fc2 + ln2
        (hd2, hd, True),          # dec fc3 + ln3
        (hd, output_dim, False),  # dec fc4 (sigmoid)
    ]
    layers = []
    for fan_in, fan_out, has_ln in layer_shapes:
        key, kw, kb, kg, kbe = jax.random.split(key, 5)
        w = jax.random.normal(kw, (fan_out, fan_in), dtype) * (fan_in ** -0.5)
        b = jax.random.normal(kb, (fan_out,), dtype) * 0.05
        if has_ln:
            g = 1.0 + 0.1 * jax.random.normal(kg, (fan_out,), dtype)
            be = 0.1 * jax.random.normal(kbe, (fan_out,), dtype)
        else:
            g = be = None
        layers.append((w, b, g, be))
    return layers


def reference_forward(x, layers, eps=LN_EPS):
    """Pure-JAX f32 emulation of the PyTorch module."""
    h = x.astype(jnp.float32)
    n = len(layers)
    for idx, (w, b, g, be) in enumerate(layers):
        h = h @ w.T.astype(jnp.float32) + b
        if g is not None:
            mean = jnp.mean(h, axis=-1, keepdims=True)
            var = jnp.mean((h - mean) ** 2, axis=-1, keepdims=True)
            h = (h - mean) / jnp.sqrt(var + eps) * g + be
        if idx == n - 1:
            h = 1.0 / (1.0 + jnp.exp(-h))          # sigmoid
        else:
            h = jnp.maximum(h, 0.0)                # relu
    return h


# ---------------------------------------------------------------------------
# Kernel-layout packing: W -> (in,out) padded to 128-multiples, all per-layer
# bias/gamma/beta vectors concatenated into ONE f32 table (one operand / DMA).
# ---------------------------------------------------------------------------
def pack_params_for_kernel(layers, matmul_dtype=jnp.bfloat16):
    """Returns (weights, vec_table, meta):
       weights   : list of padded W (Kp, Np) in matmul_dtype
       vec_table : (rows_pad, max_Np) f32, rows = bias / gamma / beta per layer
       meta      : per-layer dict {np_pad, n_true, b_row, g_row, be_row}
    Zero padding keeps padded lanes exactly zero through every layer."""
    weights, meta, vec_rows = [], [], []
    max_np, row = 0, 0
    for w, b, g, be in layers:
        fan_out, fan_in = w.shape
        kp = _round_up(fan_in, 128)
        np_ = _round_up(fan_out, 128)
        max_np = max(max_np, np_)
        weights.append(_pad2(jnp.asarray(w.T, dtype=matmul_dtype), kp, np_))
        b_row = row
        row += 1
        vec_rows.append(b.astype(jnp.float32))
        if g is not None:
            g_row, be_row = row, row + 1
            row += 2
            vec_rows.append(g.astype(jnp.float32))
            vec_rows.append(be.astype(jnp.float32))
        else:
            g_row = be_row = None
        meta.append(dict(np_pad=np_, n_true=fan_out,
                         b_row=b_row, g_row=g_row, be_row=be_row))
    rows_pad = _round_up(max(row, 8), 8)
    vec_table = jnp.zeros((rows_pad, max_np), jnp.float32)
    for r, vec in enumerate(vec_rows):
        vec_table = vec_table.at[r, :vec.shape[0]].set(vec)
    return weights, vec_table, meta


# ---------------------------------------------------------------------------
# Fused autoencoder forward (single pallas_call, batch-tiled grid)
# ---------------------------------------------------------------------------
def autoencoder_forward(x, weights, vec_table, meta, *, block_b=None,
                        eps=LN_EPS, vmem_cap_bytes=32 * 1024 * 1024):
    B, in_dim = x.shape
    in_pad = weights[0].shape[0]
    out_pad = weights[-1].shape[1]
    out_dim = meta[-1]["n_true"]
    mm_dtype = weights[0].dtype
    mm_bytes = jnp.dtype(mm_dtype).itemsize
    max_pad = max(in_pad, max(w.shape[1] for w in weights))
    sublane = 16 if mm_bytes == 2 else 8  # bf16 packs 2 rows / sublane

    # Resident parameter bytes (single-buffered via pl.Buffered(1)).
    weight_bytes = sum(w.size * mm_bytes for w in weights)
    vec_bytes = vec_table.size * 4

    def vmem_estimate(bb):
        x_tile = bb * in_pad * mm_bytes * 2      # double-buffered batch tile
        o_tile = bb * out_pad * 4 * 2            # double-buffered output tile
        act = 4 * bb * max_pad * 4               # h + f32 temporaries
        return weight_bytes + vec_bytes + x_tile + o_tile + act

    if block_b is None:
        if B >= 128:
            # Fill the MXU M-dimension: 128-multiple tiles, up to 512 rows.
            block_b = min(512, _round_up(min(B, 512), 128))
        else:
            # Single grid step: v5e/v6e have one TC, extra steps are overhead.
            block_b = _round_up(B, sublane)
        while block_b > sublane and vmem_estimate(block_b) > vmem_cap_bytes:
            block_b = max(sublane, _round_up(block_b // 2, sublane))
    B_pad = _round_up(B, block_b)

    # Explicit VMEM budget -> scoped limit (keeps v7x's 64 MiB honest).
    est = vmem_estimate(block_b)
    vmem_limit_bytes = int(min(max(est * 3 // 2, 16 << 20), 48 << 20))

    # Pad batch rows / input lanes once, directly in the matmul dtype.
    x_p = jnp.zeros((B_pad, in_pad), mm_dtype).at[:B, :in_dim].set(
        x.astype(mm_dtype))

    n_layers = len(weights)
    const_buf1 = dict(pipeline_mode=pl.Buffered(1))  # resident, never re-DMA'd

    in_specs = [pl.BlockSpec((block_b, in_pad), lambda i: (i, 0))]
    in_specs += [pl.BlockSpec(w.shape, lambda i: (0, 0), **const_buf1)
                 for w in weights]
    in_specs += [pl.BlockSpec(vec_table.shape, lambda i: (0, 0), **const_buf1)]
    operands = [x_p, *weights, vec_table]

    def kernel(x_ref, *rest):
        w_refs = rest[:n_layers]
        vec_ref = rest[n_layers]
        o_ref = rest[n_layers + 1]
        h = x_ref[...]                                   # matmul dtype
        for li in range(n_layers):
            m = meta[li]
            np_l = m["np_pad"]
            w = w_refs[li][...]
            # bf16 (or f32) MXU operands, f32 accumulation + f32 epilogue.
            h = jnp.dot(h.astype(w.dtype), w,
                        preferred_element_type=jnp.float32)
            h = h + vec_ref[m["b_row"]:m["b_row"] + 1, :np_l]
            if m["g_row"] is not None:
                g = vec_ref[m["g_row"]:m["g_row"] + 1, :np_l]
                be = vec_ref[m["be_row"]:m["be_row"] + 1, :np_l]
                inv_n = 1.0 / m["n_true"]
                # One-pass moments: padded lanes of h are exactly zero, so
                # sums over the padded width with the true count are exact.
                s1 = jnp.sum(h, axis=-1, keepdims=True)
                s2 = jnp.sum(h * h, axis=-1, keepdims=True)
                mean = s1 * inv_n
                var = jnp.maximum(s2 * inv_n - mean * mean, 0.0)
                inv = jax.lax.rsqrt(var + eps)
                # gamma/beta zero-padded -> padded lanes stay exactly zero.
                h = (h - mean) * inv * g + be
            if li == n_layers - 1:
                # sigmoid(h) == 0.5*tanh(0.5*h)+0.5 -> EUP tanh, no VALU divide
                h = 0.5 * jnp.tanh(0.5 * h) + 0.5
            else:
                h = jnp.maximum(h, 0.0)                  # relu
        o_ref[...] = h.astype(o_ref.dtype)

    # Advisory cost estimate for the XLA scheduler.
    flops = sum(2 * B_pad * w.shape[0] * w.shape[1] for w in weights)
    bytes_accessed = (x_p.size * mm_bytes + B_pad * out_pad * 4
                      + weight_bytes + vec_bytes)
    transcendentals = B_pad * (out_pad + 6)  # final tanh + 6 rsqrt per row

    out = pl.pallas_call(
        kernel,
        out_shape=jax.ShapeDtypeStruct((B_pad, out_pad), jnp.float32),
        grid_spec=pltpu.PrefetchScalarGridSpec(
            num_scalar_prefetch=0,
            grid=(B_pad // block_b,),
            in_specs=in_specs,
            out_specs=pl.BlockSpec((block_b, out_pad), lambda i: (i, 0)),
        ),
        compiler_params=pltpu.CompilerParams(
            dimension_semantics=("parallel",),
            vmem_limit_bytes=vmem_limit_bytes),
        cost_estimate=pl.CostEstimate(flops=int(flops),
                                      transcendentals=int(transcendentals),
                                      bytes_accessed=int(bytes_accessed)),
    )(*operands)

    # Strip batch / lane padding (in-kernel output stores stay lane-dense).
    return out[:B, :out_dim]


# ---------------------------------------------------------------------------
if __name__ == "__main__":
    # Small shapes consistent with the module: x is (batch, input_dim).
    batch, input_dim, hidden_dim, output_dim = 16, 48, 32, 48

    key = jax.random.PRNGKey(0)
    kx, kp = jax.random.split(key)
    x = jax.random.normal(kx, (batch, input_dim), jnp.float32)
    layers = init_autoencoder_params(kp, input_dim, hidden_dim, output_dim)

    ref = reference_forward(x, layers)

    # f32 matmul operands: tight check against the pure-JAX reference.
    w_f32, v_f32, meta_f32 = pack_params_for_kernel(layers,
                                                    matmul_dtype=jnp.float32)
    out_f32 = jax.block_until_ready(
        autoencoder_forward(x, w_f32, v_f32, meta_f32))
    assert out_f32.shape == (batch, output_dim)
    assert bool(jnp.allclose(out_f32, ref, atol=1e-3, rtol=1e-3)), \
        "f32 kernel mismatch vs reference"

    # bf16 matmul operands (default fast path on v5e/v6e/v7x), f32 epilogue.
    w_b16, v_b16, meta_b16 = pack_params_for_kernel(layers,
                                                    matmul_dtype=jnp.bfloat16)
    out_b16 = jax.block_until_ready(
        autoencoder_forward(x, w_b16, v_b16, meta_b16))
    assert bool(jnp.allclose(out_b16, ref, atol=5e-2)), \
        "bf16 kernel mismatch vs reference"

    print("KERNEL_OK")
</pallas_src>

<mosaic_0001>
module attributes {stable_mosaic.version = 11 : i64} {
  func.func @kernel(%arg0: i32, %arg1: memref<16x128xf32, #tpu.memory_space<vmem>>, %arg2: memref<128x128xf32, #tpu.memory_space<vmem>>, %arg3: memref<128x128xf32, #tpu.memory_space<vmem>>, %arg4: memref<128x128xf32, #tpu.memory_space<vmem>>, %arg5: memref<128x128xf32, #tpu.memory_space<vmem>>, %arg6: memref<128x128xf32, #tpu.memory_space<vmem>>, %arg7: memref<128x128xf32, #tpu.memory_space<vmem>>, %arg8: memref<128x128xf32, #tpu.memory_space<vmem>>, %arg9: memref<128x128xf32, #tpu.memory_space<vmem>>, %arg10: memref<24x128xf32, #tpu.memory_space<vmem>>, %arg11: memref<16x128xf32, #tpu.memory_space<vmem>>) attributes {dimension_semantics = [#tpu.dimension_semantics<parallel>], iteration_bounds = array<i64: 1>, scalar_prefetch = 0 : i64, scratch_operands = 0 : i64, tpu.core_type = #tpu.core_type<tc>, window_params = [{transform_indices = @transform_0, window_bounds = array<i64: 16, 128>}, {pipeline_mode = #tpu.pipeline_mode<synchronous>, transform_indices = @transform_1, window_bounds = array<i64: 128, 128>}, {pipeline_mode = #tpu.pipeline_mode<synchronous>, transform_indices = @transform_2, window_bounds = array<i64: 128, 128>}, {pipeline_mode = #tpu.pipeline_mode<synchronous>, transform_indices = @transform_3, window_bounds = array<i64: 128, 128>}, {pipeline_mode = #tpu.pipeline_mode<synchronous>, transform_indices = @transform_4, window_bounds = array<i64: 128, 128>}, {pipeline_mode = #tpu.pipeline_mode<synchronous>, transform_indices = @transform_5, window_bounds = array<i64: 128, 128>}, {pipeline_mode = #tpu.pipeline_mode<synchronous>, transform_indices = @transform_6, window_bounds = array<i64: 128, 128>}, {pipeline_mode = #tpu.pipeline_mode<synchronous>, transform_indices = @transform_7, window_bounds = array<i64: 128, 128>}, {pipeline_mode = #tpu.pipeline_mode<synchronous>, transform_indices = @transform_8, window_bounds = array<i64: 128, 128>}, {pipeline_mode = #tpu.pipeline_mode<synchronous>, transform_indices = @transform_9, window_bounds = array<i64: 24, 128>}, {transform_indices = @transform_10, window_bounds = array<i64: 16, 128>}]} {
    %c0 = arith.constant 0 : index
    %c0_0 = arith.constant 0 : index
    %0 = vector.load %arg1[%c0, %c0_0] : memref<16x128xf32, #tpu.memory_space<vmem>>, vector<16x128xf32>
    %c0_1 = arith.constant 0 : index
    %c0_2 = arith.constant 0 : index
    %1 = vector.load %arg2[%c0_1, %c0_2] : memref<128x128xf32, #tpu.memory_space<vmem>>, vector<128x128xf32>
    %cst = arith.constant dense<0.000000e+00> : vector<16x128xf32>
    %2 = tpu.matmul %0, %1, %cst {dimension_numbers = #tpu.dot_dimension_numbers<[1], [0], [0], [1], [0, 0, 1, 1], [], []>} : vector<16x128xf32>, vector<128x128xf32>, vector<16x128xf32> -> vector<16x128xf32>
    %c0_3 = arith.constant 0 : index
    %c0_4 = arith.constant 0 : index
    %3 = vector.load %arg10[%c0_3, %c0_4] : memref<24x128xf32, #tpu.memory_space<vmem>>, vector<1x128xf32>
    %4 = vector.broadcast %3 : vector<1x128xf32> to vector<16x128xf32>
    %5 = arith.addf %2, %4 : vector<16x128xf32>
    %c1 = arith.constant 1 : index
    %c0_5 = arith.constant 0 : index
    %6 = vector.load %arg10[%c1, %c0_5] : memref<24x128xf32, #tpu.memory_space<vmem>>, vector<1x128xf32>
    %c2 = arith.constant 2 : index
    %c0_6 = arith.constant 0 : index
    %7 = vector.load %arg10[%c2, %c0_6] : memref<24x128xf32, #tpu.memory_space<vmem>>, vector<1x128xf32>
    %cst_7 = arith.constant dense<0.000000e+00> : vector<16xf32>
    %8 = vector.multi_reduction <add>, %5, %cst_7 [1] : vector<16x128xf32> to vector<16xf32>
    %9 = vector.shape_cast %8 : vector<16xf32> to vector<16x1xf32>
    %10 = arith.mulf %5, %5 : vector<16x128xf32>
    %cst_8 = arith.constant dense<0.000000e+00> : vector<16xf32>
    %11 = vector.multi_reduction <add>, %10, %cst_8 [1] : vector<16x128xf32> to vector<16xf32>
    %12 = vector.shape_cast %11 : vector<16xf32> to vector<16x1xf32>
    %cst_9 = arith.constant 3.125000e-02 : f32
    %13 = vector.broadcast %cst_9 : f32 to vector<16x1xf32>
    %14 = arith.mulf %9, %13 : vector<16x1xf32>
    %cst_10 = arith.constant 3.125000e-02 : f32
    %15 = vector.broadcast %cst_10 : f32 to vector<16x1xf32>
    %16 = arith.mulf %12, %15 : vector<16x1xf32>
    %17 = arith.mulf %14, %14 : vector<16x1xf32>
    %18 = arith.subf %16, %17 : vector<16x1xf32>
    %cst_11 = arith.constant 0.000000e+00 : f32
    %19 = vector.broadcast %cst_11 : f32 to vector<16x1xf32>
    %20 = arith.maximumf %18, %19 : vector<16x1xf32>
    %cst_12 = arith.constant 9.99999974E-6 : f32
    %21 = vector.broadcast %cst_12 : f32 to vector<16x1xf32>
    %22 = arith.addf %20, %21 : vector<16x1xf32>
    %23 = math.rsqrt %22 : vector<16x1xf32>
    %24 = vector.broadcast %14 : vector<16x1xf32> to vector<16x128xf32>
    %25 = arith.subf %5, %24 : vector<16x128xf32>
    %26 = vector.broadcast %23 : vector<16x1xf32> to vector<16x128xf32>
    %27 = arith.mulf %25, %26 : vector<16x128xf32>
    %28 = vector.broadcast %6 : vector<1x128xf32> to vector<16x128xf32>
    %29 = arith.mulf %27, %28 : vector<16x128xf32>
    %30 = vector.broadcast %7 : vector<1x128xf32> to vector<16x128xf32>
    %31 = arith.addf %29, %30 : vector<16x128xf32>
    %cst_13 = arith.constant 0.000000e+00 : f32
    %32 = vector.broadcast %cst_13 : f32 to vector<16x128xf32>
    %33 = arith.maximumf %31, %32 : vector<16x128xf32>
    %c0_14 = arith.constant 0 : index
    %c0_15 = arith.constant 0 : index
    %34 = vector.load %arg3[%c0_14, %c0_15] : memref<128x128xf32, #tpu.memory_space<vmem>>, vector<128x128xf32>
    %cst_16 = arith.constant dense<0.000000e+00> : vector<16x128xf32>
    %35 = tpu.matmul %33, %34, %cst_16 {dimension_numbers = #tpu.dot_dimension_numbers<[1], [0], [0], [1], [0, 0, 1, 1], [], []>} : vector<16x128xf32>, vector<128x128xf32>, vector<16x128xf32> -> vector<16x128xf32>
    %c3 = arith.constant 3 : index
    %c0_17 = arith.constant 0 : index
    %36 = vector.load %arg10[%c3, %c0_17] : memref<24x128xf32, #tpu.memory_space<vmem>>, vector<1x128xf32>
    %37 = vector.broadcast %36 : vector<1x128xf32> to vector<16x128xf32>
    %38 = arith.addf %35, %37 : vector<16x128xf32>
    %c4 = arith.constant 4 : index
    %c0_18 = arith.constant 0 : index
    %39 = vector.load %arg10[%c4, %c0_18] : memref<24x128xf32, #tpu.memory_space<vmem>>, vector<1x128xf32>
    %c5 = arith.constant 5 : index
    %c0_19 = arith.constant 0 : index
    %40 = vector.load %arg10[%c5, %c0_19] : memref<24x128xf32, #tpu.memory_space<vmem>>, vector<1x128xf32>
    %cst_20 = arith.constant dense<0.000000e+00> : vector<16xf32>
    %41 = vector.multi_reduction <add>, %38, %cst_20 [1] : vector<16x128xf32> to vector<16xf32>
    %42 = vector.shape_cast %41 : vector<16xf32> to vector<16x1xf32>
    %43 = arith.mulf %38, %38 : vector<16x128xf32>
    %cst_21 = arith.constant dense<0.000000e+00> : vector<16xf32>
    %44 = vector.multi_reduction <add>, %43, %cst_21 [1] : vector<16x128xf32> to vector<16xf32>
    %45 = vector.shape_cast %44 : vector<16xf32> to vector<16x1xf32>
    %cst_22 = arith.constant 1.562500e-02 : f32
    %46 = vector.broadcast %cst_22 : f32 to vector<16x1xf32>
    %47 = arith.mulf %42, %46 : vector<16x1xf32>
    %cst_23 = arith.constant 1.562500e-02 : f32
    %48 = vector.broadcast %cst_23 : f32 to vector<16x1xf32>
    %49 = arith.mulf %45, %48 : vector<16x1xf32>
    %50 = arith.mulf %47, %47 : vector<16x1xf32>
    %51 = arith.subf %49, %50 : vector<16x1xf32>
    %cst_24 = arith.constant 0.000000e+00 : f32
    %52 = vector.broadcast %cst_24 : f32 to vector<16x1xf32>
    %53 = arith.maximumf %51, %52 : vector<16x1xf32>
    %cst_25 = arith.constant 9.99999974E-6 : f32
    %54 = vector.broadcast %cst_25 : f32 to vector<16x1xf32>
    %55 = arith.addf %53, %54 : vector<16x1xf32>
    %56 = math.rsqrt %55 : vector<16x1xf32>
    %57 = vector.broadcast %47 : vector<16x1xf32> to vector<16x128xf32>
    %58 = arith.subf %38, %57 : vector<16x128xf32>
    %59 = vector.broadcast %56 : vector<16x1xf32> to vector<16x128xf32>
    %60 = arith.mulf %58, %59 : vector<16x128xf32>
    %61 = vector.broadcast %39 : vector<1x128xf32> to vector<16x128xf32>
    %62 = arith.mulf %60, %61 : vector<16x128xf32>
    %63 = vector.broadcast %40 : vector<1x128xf32> to vector<16x128xf32>
    %64 = arith.addf %62, %63 : vector<16x128xf32>
    %cst_26 = arith.constant 0.000000e+00 : f32
    %65 = vector.broadcast %cst_26 : f32 to vector<16x128xf32>
    %66 = arith.maximumf %64, %65 : vector<16x128xf32>
    %c0_27 = arith.constant 0 : index
    %c0_28 = arith.constant 0 : index
    %67 = vector.load %arg4[%c0_27, %c0_28] : memref<128x128xf32, #tpu.memory_space<vmem>>, vector<128x128xf32>
    %cst_29 = arith.constant dense<0.000000e+00> : vector<16x128xf32>
    %68 = tpu.matmul %66, %67, %cst_29 {dimension_numbers = #tpu.dot_dimension_numbers<[1], [0], [0], [1], [0, 0, 1, 1], [], []>} : vector<16x128xf32>, vector<128x128xf32>, vector<16x128xf32> -> vector<16x128xf32>
    %c6 = arith.constant 6 : index
    %c0_30 = arith.constant 0 : index
    %69 = vector.load %arg10[%c6, %c0_30] : memref<24x128xf32, #tpu.memory_space<vmem>>, vector<1x128xf32>
    %70 = vector.broadcast %69 : vector<1x128xf32> to vector<16x128xf32>
    %71 = arith.addf %68, %70 : vector<16x128xf32>
    %c7 = arith.constant 7 : index
    %c0_31 = arith.constant 0 : index
    %72 = vector.load %arg10[%c7, %c0_31] : memref<24x128xf32, #tpu.memory_space<vmem>>, vector<1x128xf32>
    %c8 = arith.constant 8 : index
    %c0_32 = arith.constant 0 : index
    %73 = vector.load %arg10[%c8, %c0_32] : memref<24x128xf32, #tpu.memory_space<vmem>>, vector<1x128xf32>
    %cst_33 = arith.constant dense<0.000000e+00> : vector<16xf32>
    %74 = vector.multi_reduction <add>, %71, %cst_33 [1] : vector<16x128xf32> to vector<16xf32>
    %75 = vector.shape_cast %74 : vector<16xf32> to vector<16x1xf32>
    %76 = arith.mulf %71, %71 : vector<16x128xf32>
    %cst_34 = arith.constant dense<0.000000e+00> : vector<16xf32>
    %77 = vector.multi_reduction <add>, %76, %cst_34 [1] : vector<16x128xf32> to vector<16xf32>
    %78 = vector.shape_cast %77 : vector<16xf32> to vector<16x1xf32>
    %cst_35 = arith.constant 7.812500e-03 : f32
    %79 = vector.broadcast %cst_35 : f32 to vector<16x1xf32>
    %80 = arith.mulf %75, %79 : vector<16x1xf32>
    %cst_36 = arith.constant 7.812500e-03 : f32
    %81 = vector.broadcast %cst_36 : f32 to vector<16x1xf32>
    %82 = arith.mulf %78, %81 : vector<16x1xf32>
    %83 = arith.mulf %80, %80 : vector<16x1xf32>
    %84 = arith.subf %82, %83 : vector<16x1xf32>
    %cst_37 = arith.constant 0.000000e+00 : f32
    %85 = vector.broadcast %cst_37 : f32 to vector<16x1xf32>
    %86 = arith.maximumf %84, %85 : vector<16x1xf32>
    %cst_38 = arith.constant 9.99999974E-6 : f32
    %87 = vector.broadcast %cst_38 : f32 to vector<16x1xf32>
    %88 = arith.addf %86, %87 : vector<16x1xf32>
    %89 = math.rsqrt %88 : vector<16x1xf32>
    %90 = vector.broadcast %80 : vector<16x1xf32> to vector<16x128xf32>
    %91 = arith.subf %71, %90 : vector<16x128xf32>
    %92 = vector.broadcast %89 : vector<16x1xf32> to vector<16x128xf32>
    %93 = arith.mulf %91, %92 : vector<16x128xf32>
    %94 = vector.broadcast %72 : vector<1x128xf32> to vector<16x128xf32>
    %95 = arith.mulf %93, %94 : vector<16x128xf32>
    %96 = vector.broadcast %73 : vector<1x128xf32> to vector<16x128xf32>
    %97 = arith.addf %95, %96 : vector<16x128xf32>
    %cst_39 = arith.constant 0.000000e+00 : f32
    %98 = vector.broadcast %cst_39 : f32 to vector<16x128xf32>
    %99 = arith.maximumf %97, %98 : vector<16x128xf32>
    %c0_40 = arith.constant 0 : index
    %c0_41 = arith.constant 0 : index
    %100 = vector.load %arg5[%c0_40, %c0_41] : memref<128x128xf32, #tpu.memory_space<vmem>>, vector<128x128xf32>
    %cst_42 = arith.constant dense<0.000000e+00> : vector<16x128xf32>
    %101 = tpu.matmul %99, %100, %cst_42 {dimension_numbers = #tpu.dot_dimension_numbers<[1], [0], [0], [1], [0, 0, 1, 1], [], []>} : vector<16x128xf32>, vector<128x128xf32>, vector<16x128xf32> -> vector<16x128xf32>
    %c9 = arith.constant 9 : index
    %c0_43 = arith.constant 0 : index
    %102 = vector.load %arg10[%c9, %c0_43] : memref<24x128xf32, #tpu.memory_space<vmem>>, vector<1x128xf32>
    %103 = vector.broadcast %102 : vector<1x128xf32> to vector<16x128xf32>
    %104 = arith.addf %101, %103 : vector<16x128xf32>
    %cst_44 = arith.constant 0.000000e+00 : f32
    %105 = vector.broadcast %cst_44 : f32 to vector<16x128xf32>
    %106 = arith.maximumf %104, %105 : vector<16x128xf32>
    %c0_45 = arith.constant 0 : index
    %c0_46 = arith.constant 0 : index
    %107 = vector.load %arg6[%c0_45, %c0_46] : memref<128x128xf32, #tpu.memory_space<vmem>>, vector<128x128xf32>
    %cst_47 = arith.constant dense<0.000000e+00> : vector<16x128xf32>
    %108 = tpu.matmul %106, %107, %cst_47 {dimension_numbers = #tpu.dot_dimension_numbers<[1], [0], [0], [1], [0, 0, 1, 1], [], []>} : vector<16x128xf32>, vector<128x128xf32>, vector<16x128xf32> -> vector<16x128xf32>
    %c10 = arith.constant 10 : index
    %c0_48 = arith.constant 0 : index
    %109 = vector.load %arg10[%c10, %c0_48] : memref<24x128xf32, #tpu.memory_space<vmem>>, vector<1x128xf32>
    %110 = vector.broadcast %109 : vector<1x128xf32> to vector<16x128xf32>
    %111 = arith.addf %108, %110 : vector<16x128xf32>
    %c11 = arith.constant 11 : index
    %c0_49 = arith.constant 0 : index
    %112 = vector.load %arg10[%c11, %c0_49] : memref<24x128xf32, #tpu.memory_space<vmem>>, vector<1x128xf32>
    %c12 = arith.constant 12 : index
    %c0_50 = arith.constant 0 : index
    %113 = vector.load %arg10[%c12, %c0_50] : memref<24x128xf32, #tpu.memory_space<vmem>>, vector<1x128xf32>
    %cst_51 = arith.constant dense<0.000000e+00> : vector<16xf32>
    %114 = vector.multi_reduction <add>, %111, %cst_51 [1] : vector<16x128xf32> to vector<16xf32>
    %115 = vector.shape_cast %114 : vector<16xf32> to vector<16x1xf32>
    %116 = arith.mulf %111, %111 : vector<16x128xf32>
    %cst_52 = arith.constant dense<0.000000e+00> : vector<16xf32>
    %117 = vector.multi_reduction <add>, %116, %cst_52 [1] : vector<16x128xf32> to vector<16xf32>
    %118 = vector.shape_cast %117 : vector<16xf32> to vector<16x1xf32>
    %cst_53 = arith.constant 7.812500e-03 : f32
    %119 = vector.broadcast %cst_53 : f32 to vector<16x1xf32>
    %120 = arith.mulf %115, %119 : vector<16x1xf32>
    %cst_54 = arith.constant 7.812500e-03 : f32
    %121 = vector.broadcast %cst_54 : f32 to vector<16x1xf32>
    %122 = arith.mulf %118, %121 : vector<16x1xf32>
    %123 = arith.mulf %120, %120 : vector<16x1xf32>
    %124 = arith.subf %122, %123 : vector<16x1xf32>
    %cst_55 = arith.constant 0.000000e+00 : f32
    %125 = vector.broadcast %cst_55 : f32 to vector<16x1xf32>
    %126 = arith.maximumf %124, %125 : vector<16x1xf32>
    %cst_56 = arith.constant 9.99999974E-6 : f32
    %127 = vector.broadcast %cst_56 : f32 to vector<16x1xf32>
    %128 = arith.addf %126, %127 : vector<16x1xf32>
    %129 = math.rsqrt %128 : vector<16x1xf32>
    %130 = vector.broadcast %120 : vector<16x1xf32> to vector<16x128xf32>
    %131 = arith.subf %111, %130 : vector<16x128xf32>
    %132 = vector.broadcast %129 : vector<16x1xf32> to vector<16x128xf32>
    %133 = arith.mulf %131, %132 : vector<16x128xf32>
    %134 = vector.broadcast %112 : vector<1x128xf32> to vector<16x128xf32>
    %135 = arith.mulf %133, %134 : vector<16x128xf32>
    %136 = vector.broadcast %113 : vector<1x128xf32> to vector<16x128xf32>
    %137 = arith.addf %135, %136 : vector<16x128xf32>
    %cst_57 = arith.constant 0.000000e+00 : f32
    %138 = vector.broadcast %cst_57 : f32 to vector<16x128xf32>
    %139 = arith.maximumf %137, %138 : vector<16x128xf32>
    %c0_58 = arith.constant 0 : index
    %c0_59 = arith.constant 0 : index
    %140 = vector.load %arg7[%c0_58, %c0_59] : memref<128x128xf32, #tpu.memory_space<vmem>>, vector<128x128xf32>
    %cst_60 = arith.constant dense<0.000000e+00> : vector<16x128xf32>
    %141 = tpu.matmul %139, %140, %cst_60 {dimension_numbers = #tpu.dot_dimension_numbers<[1], [0], [0], [1], [0, 0, 1, 1], [], []>} : vector<16x128xf32>, vector<128x128xf32>, vector<16x128xf32> -> vector<16x128xf32>
    %c13 = arith.constant 13 : index
    %c0_61 = arith.constant 0 : index
    %142 = vector.load %arg10[%c13, %c0_61] : memref<24x128xf32, #tpu.memory_space<vmem>>, vector<1x128xf32>
    %143 = vector.broadcast %142 : vector<1x128xf32> to vector<16x128xf32>
    %144 = arith.addf %141, %143 : vector<16x128xf32>
    %c14 = arith.constant 14 : index
    %c0_62 = arith.constant 0 : index
    %145 = vector.load %arg10[%c14, %c0_62] : memref<24x128xf32, #tpu.memory_space<vmem>>, vector<1x128xf32>
    %c15 = arith.constant 15 : index
    %c0_63 = arith.constant 0 : index
    %146 = vector.load %arg10[%c15, %c0_63] : memref<24x128xf32, #tpu.memory_space<vmem>>, vector<1x128xf32>
    %cst_64 = arith.constant dense<0.000000e+00> : vector<16xf32>
    %147 = vector.multi_reduction <add>, %144, %cst_64 [1] : vector<16x128xf32> to vector<16xf32>
    %148 = vector.shape_cast %147 : vector<16xf32> to vector<16x1xf32>
    %149 = arith.mulf %144, %144 : vector<16x128xf32>
    %cst_65 = arith.constant dense<0.000000e+00> : vector<16xf32>
    %150 = vector.multi_reduction <add>, %149, %cst_65 [1] : vector<16x128xf32> to vector<16xf32>
    %151 = vector.shape_cast %150 : vector<16xf32> to vector<16x1xf32>
    %cst_66 = arith.constant 1.562500e-02 : f32
    %152 = vector.broadcast %cst_66 : f32 to vector<16x1xf32>
    %153 = arith.mulf %148, %152 : vector<16x1xf32>
    %cst_67 = arith.constant 1.562500e-02 : f32
    %154 = vector.broadcast %cst_67 : f32 to vector<16x1xf32>
    %155 = arith.mulf %151, %154 : vector<16x1xf32>
    %156 = arith.mulf %153, %153 : vector<16x1xf32>
    %157 = arith.subf %155, %156 : vector<16x1xf32>
    %cst_68 = arith.constant 0.000000e+00 : f32
    %158 = vector.broadcast %cst_68 : f32 to vector<16x1xf32>
    %159 = arith.maximumf %157, %158 : vector<16x1xf32>
    %cst_69 = arith.constant 9.99999974E-6 : f32
    %160 = vector.broadcast %cst_69 : f32 to vector<16x1xf32>
    %161 = arith.addf %159, %160 : vector<16x1xf32>
    %162 = math.rsqrt %161 : vector<16x1xf32>
    %163 = vector.broadcast %153 : vector<16x1xf32> to vector<16x128xf32>
    %164 = arith.subf %144, %163 : vector<16x128xf32>
    %165 = vector.broadcast %162 : vector<16x1xf32> to vector<16x128xf32>
    %166 = arith.mulf %164, %165 : vector<16x128xf32>
    %167 = vector.broadcast %145 : vector<1x128xf32> to vector<16x128xf32>
    %168 = arith.mulf %166, %167 : vector<16x128xf32>
    %169 = vector.broadcast %146 : vector<1x128xf32> to vector<16x128xf32>
    %170 = arith.addf %168, %169 : vector<16x128xf32>
    %cst_70 = arith.constant 0.000000e+00 : f32
    %171 = vector.broadcast %cst_70 : f32 to vector<16x128xf32>
    %172 = arith.maximumf %170, %171 : vector<16x128xf32>
    %c0_71 = arith.constant 0 : index
    %c0_72 = arith.constant 0 : index
    %173 = vector.load %arg8[%c0_71, %c0_72] : memref<128x128xf32, #tpu.memory_space<vmem>>, vector<128x128xf32>
    %cst_73 = arith.constant dense<0.000000e+00> : vector<16x128xf32>
    %174 = tpu.matmul %172, %173, %cst_73 {dimension_numbers = #tpu.dot_dimension_numbers<[1], [0], [0], [1], [0, 0, 1, 1], [], []>} : vector<16x128xf32>, vector<128x128xf32>, vector<16x128xf32> -> vector<16x128xf32>
    %c16 = arith.constant 16 : index
    %c0_74 = arith.constant 0 : index
    %175 = vector.load %arg10[%c16, %c0_74] : memref<24x128xf32, #tpu.memory_space<vmem>>, vector<1x128xf32>
    %176 = vector.broadcast %175 : vector<1x128xf32> to vector<16x128xf32>
    %177 = arith.addf %174, %176 : vector<16x128xf32>
    %c17 = arith.constant 17 : index
    %c0_75 = arith.constant 0 : index
    %178 = vector.load %arg10[%c17, %c0_75] : memref<24x128xf32, #tpu.memory_space<vmem>>, vector<1x128xf32>
    %c18 = arith.constant 18 : index
    %c0_76 = arith.constant 0 : index
    %179 = vector.load %arg10[%c18, %c0_76] : memref<24x128xf32, #tpu.memory_space<vmem>>, vector<1x128xf32>
    %cst_77 = arith.constant dense<0.000000e+00> : vector<16xf32>
    %180 = vector.multi_reduction <add>, %177, %cst_77 [1] : vector<16x128xf32> to vector<16xf32>
    %181 = vector.shape_cast %180 : vector<16xf32> to vector<16x1xf32>
    %182 = arith.mulf %177, %177 : vector<16x128xf32>
    %cst_78 = arith.constant dense<0.000000e+00> : vector<16xf32>
    %183 = vector.multi_reduction <add>, %182, %cst_78 [1] : vector<16x128xf32> to vector<16xf32>
    %184 = vector.shape_cast %183 : vector<16xf32> to vector<16x1xf32>
    %cst_79 = arith.constant 3.125000e-02 : f32
    %185 = vector.broadcast %cst_79 : f32 to vector<16x1xf32>
    %186 = arith.mulf %181, %185 : vector<16x1xf32>
    %cst_80 = arith.constant 3.125000e-02 : f32
    %187 = vector.broadcast %cst_80 : f32 to vector<16x1xf32>
    %188 = arith.mulf %184, %187 : vector<16x1xf32>
    %189 = arith.mulf %186, %186 : vector<16x1xf32>
    %190 = arith.subf %188, %189 : vector<16x1xf32>
    %cst_81 = arith.constant 0.000000e+00 : f32
    %191 = vector.broadcast %cst_81 : f32 to vector<16x1xf32>
    %192 = arith.maximumf %190, %191 : vector<16x1xf32>
    %cst_82 = arith.constant 9.99999974E-6 : f32
    %193 = vector.broadcast %cst_82 : f32 to vector<16x1xf32>
    %194 = arith.addf %192, %193 : vector<16x1xf32>
    %195 = math.rsqrt %194 : vector<16x1xf32>
    %196 = vector.broadcast %186 : vector<16x1xf32> to vector<16x128xf32>
    %197 = arith.subf %177, %196 : vector<16x128xf32>
    %198 = vector.broadcast %195 : vector<16x1xf32> to vector<16x128xf32>
    %199 = arith.mulf %197, %198 : vector<16x128xf32>
    %200 = vector.broadcast %178 : vector<1x128xf32> to vector<16x128xf32>
    %201 = arith.mulf %199, %200 : vector<16x128xf32>
    %202 = vector.broadcast %179 : vector<1x128xf32> to vector<16x128xf32>
    %203 = arith.addf %201, %202 : vector<16x128xf32>
    %cst_83 = arith.constant 0.000000e+00 : f32
    %204 = vector.broadcast %cst_83 : f32 to vector<16x128xf32>
    %205 = arith.maximumf %203, %204 : vector<16x128xf32>
    %c0_84 = arith.constant 0 : index
    %c0_85 = arith.constant 0 : index
    %206 = vector.load %arg9[%c0_84, %c0_85] : memref<128x128xf32, #tpu.memory_space<vmem>>, vector<128x128xf32>
    %cst_86 = arith.constant dense<0.000000e+00> : vector<16x128xf32>
    %207 = tpu.matmul %205, %206, %cst_86 {dimension_numbers = #tpu.dot_dimension_numbers<[1], [0], [0], [1], [0, 0, 1, 1], [], []>} : vector<16x128xf32>, vector<128x128xf32>, vector<16x128xf32> -> vector<16x128xf32>
    %c19 = arith.constant 19 : index
    %c0_87 = arith.constant 0 : index
    %208 = vector.load %arg10[%c19, %c0_87] : memref<24x128xf32, #tpu.memory_space<vmem>>, vector<1x128xf32>
    %209 = vector.broadcast %208 : vector<1x128xf32> to vector<16x128xf32>
    %210 = arith.addf %207, %209 : vector<16x128xf32>
    %cst_88 = arith.constant 5.000000e-01 : f32
    %211 = vector.broadcast %cst_88 : f32 to vector<16x128xf32>
    %212 = arith.mulf %211, %210 : vector<16x128xf32>
    %213 = math.tanh %212 : vector<16x128xf32>
    %cst_89 = arith.constant 5.000000e-01 : f32
    %214 = vector.broadcast %cst_89 : f32 to vector<16x128xf32>
    %215 = arith.mulf %214, %213 : vector<16x128xf32>
    %cst_90 = arith.constant 5.000000e-01 : f32
    %216 = vector.broadcast %cst_90 : f32 to vector<16x128xf32>
    %217 = arith.addf %215, %216 : vector<16x128xf32>
    %c0_91 = arith.constant 0 : index
    %c0_92 = arith.constant 0 : index
    %218 = vector.load %arg11[%c0_91, %c0_92] : memref<16x128xf32, #tpu.memory_space<vmem>>, vector<16x128xf32>
    tpu.vector_store %arg11[%c0_91, %c0_92], %217 {strides = array<i32>} : memref<16x128xf32, #tpu.memory_space<vmem>>, vector<16x128xf32>,
    return
  }
  func.func @transform_0(%arg0: i32) -> (i32, i32) {
    %c0_i32 = arith.constant 0 : i32
    %c0_i32_0 = arith.constant 0 : i32
    return %arg0, %c0_i32 : i32, i32
  }
  func.func @transform_1(%arg0: i32) -> (i32, i32) {
    %c0_i32 = arith.constant 0 : i32
    %c0_i32_0 = arith.constant 0 : i32
    %c0_i32_1 = arith.constant 0 : i32
    return %c0_i32, %c0_i32_0 : i32, i32
  }
  func.func @transform_2(%arg0: i32) -> (i32, i32) {
    %c0_i32 = arith.constant 0 : i32
    %c0_i32_0 = arith.constant 0 : i32
    %c0_i32_1 = arith.constant 0 : i32
    return %c0_i32, %c0_i32_0 : i32, i32
  }
  func.func @transform_3(%arg0: i32) -> (i32, i32) {
    %c0_i32 = arith.constant 0 : i32
    %c0_i32_0 = arith.constant 0 : i32
    %c0_i32_1 = arith.constant 0 : i32
    return %c0_i32, %c0_i32_0 : i32, i32
  }
  func.func @transform_4(%arg0: i32) -> (i32, i32) {
    %c0_i32 = arith.constant 0 : i32
    %c0_i32_0 = arith.constant 0 : i32
    %c0_i32_1 = arith.constant 0 : i32
    return %c0_i32, %c0_i32_0 : i32, i32
  }
  func.func @transform_5(%arg0: i32) -> (i32, i32) {
    %c0_i32 = arith.constant 0 : i32
    %c0_i32_0 = arith.constant 0 : i32
    %c0_i32_1 = arith.constant 0 : i32
    return %c0_i32, %c0_i32_0 : i32, i32
  }
  func.func @transform_6(%arg0: i32) -> (i32, i32) {
    %c0_i32 = arith.constant 0 : i32
    %c0_i32_0 = arith.constant 0 : i32
    %c0_i32_1 = arith.constant 0 : i32
    return %c0_i32, %c0_i32_0 : i32, i32
  }
  func.func @transform_7(%arg0: i32) -> (i32, i32) {
    %c0_i32 = arith.constant 0 : i32
    %c0_i32_0 = arith.constant 0 : i32
    %c0_i32_1 = arith.constant 0 : i32
    return %c0_i32, %c0_i32_0 : i32, i32
  }
  func.func @transform_8(%arg0: i32) -> (i32, i32) {
    %c0_i32 = arith.constant 0 : i32
    %c0_i32_0 = arith.constant 0 : i32
    %c0_i32_1 = arith.constant 0 : i32
    return %c0_i32, %c0_i32_0 : i32, i32
  }
  func.func @transform_9(%arg0: i32) -> (i32, i32) {
    %c0_i32 = arith.constant 0 : i32
    %c0_i32_0 = arith.constant 0 : i32
    %c0_i32_1 = arith.constant 0 : i32
    return %c0_i32, %c0_i32_0 : i32, i32
  }
  func.func @transform_10(%arg0: i32) -> (i32, i32) {
    %c0_i32 = arith.constant 0 : i32
    %c0_i32_0 = arith.constant 0 : i32
    return %arg0, %c0_i32 : i32, i32
  }
}

</mosaic_0001>

<bundles_post_ra>
// kernel: tpu_custom_call.1
= control target key start
LH: loop header
LB: loop body
LE: loop exit
PB: predicated region body
PF: predicated region fallthrough
CT: control target
= control target key end

     0   :  { %15 = vsyncpa [#allocation3], 0  ;;  %s2165_s0 = inlined_call_operand.hbm [shape: f32[16,128], index: 0, kind: input, shape index: {}]   ;;  %s2166_s1 = inlined_call_operand.hbm [shape: f32[128,128], index: 1, kind: input, shape index: {}]   ;;  %s2167_s2 = inlined_call_operand.hbm [shape: f32[128,128], index: 2, kind: input, shape index: {}]   ;;  %s2168_s3 = inlined_call_operand.hbm [shape: f32[128,128], index: 3, kind: input, shape index: {}]   ;;  %s2169_s4 = inlined_call_operand.hbm [shape: f32[128,128], index: 4, kind: input, shape index: {}]   ;;  %s2170_s5 = inlined_call_operand.hbm [shape: f32[128,128], index: 5, kind: input, shape index: {}]   ;;  %s2171_s6 = inlined_call_operand.hbm [shape: f32[128,128], index: 6, kind: input, shape index: {}]   ;;  %s2172_s7 = inlined_call_operand.hbm [shape: f32[128,128], index: 7, kind: input, shape index: {}]   ;;  %s2173_s8 = inlined_call_operand.hbm [shape: f32[128,128], index: 8, kind: input, shape index: {}]   ;;  %s2174_s9 = inlined_call_operand.hbm [shape: f32[24,128], index: 9, kind: input, shape index: {}]   ;;  %s2175_s10 = inlined_call_operand.hbm [shape: f32[16,128], index: 10, kind: output, shape index: {}]  }
   0x1   :  { %16 = vsyncpa [#allocation6], 0 }
   0x2   :  { %17 = vsyncpa [#allocation9], 0 }
   0x3   :  { %18 = vsyncpa [#allocation12], 0 }
   0x4   :  { %19 = vsyncpa [#allocation15], 0 }
   0x5   :  { %20 = vsyncpa [#allocation18], 0 }
   0x6   :  { %21 = vsyncpa [#allocation4], 0  ;;  %s1959_s13 = smov [#allocation5]   ;;  %s1960_s15 = smov [#allocation8]  }
   0x7   :  { %s39_s14 = sshll.u32 %s1959_s13, 4  ;;  %s63_s16 = sshll.u32 %s1960_s15, 4  ;;  %s40_s14 = int_to_ptr.vmem [resolvable:$true] %s39_s14  ;;  %s64_s16 = int_to_ptr.vmem [resolvable:$true] %s63_s16 }
   0x8   :  { %s1733_s17 = scalar_lea.vmem %s40_s14, 2048  ;;  %p1738_p1 = scmp.lt.s32.totalorder %s40_s14, %s40_s14 }
   0x9   :  { %p1734_p0 = scmp.ne.s32.totalorder %s40_s14, %s1733_s17  ;;  %p1739_p2 = scmp.lt.s32.totalorder %s1733_s17, %s1733_s17 }
   0xb   :  { %p1740_p3 = por %p1739_p2, %p1738_p1 }
   0xd   :  { %p1741_p4 = pnand %p1740_p3, %p1734_p0 }
   0xf   :  { %1744 = shalt.err (!%p1741_p4)
}
  0x10   :  { %s1961_s18 = smov 128   ;;  %s1962_s19 = smov 8  }
  0x11   :  { %45 = dma.hbm_to_vmem [thread:$0]  %s2166_s1, 2048, %s40_s14, [#allocation6], %s1961_s18, %s1961_s18, %s1962_s19  }
  0x12   :  { %s1753_s22 = scalar_lea.vmem %s64_s16, 2048  ;;  %p1758_p6 = scmp.lt.s32.totalorder %s64_s16, %s64_s16 }
  0x13   :  { %p1754_p5 = scmp.ne.s32.totalorder %s64_s16, %s1753_s22  ;;  %p1759_p7 = scmp.lt.s32.totalorder %s1753_s22, %s1753_s22 }
  0x15   :  { %p1760_p8 = por %p1759_p7, %p1758_p6 }
  0x17   :  { %p1761_p9 = pnand %p1760_p8, %p1754_p5 }
  0x19   :  { %1764 = shalt.err (!%p1761_p9)
}
  0x1a   :  { %69 = dma.hbm_to_vmem [thread:$0]  %s2168_s3, 2048, %s64_s16, [#allocation9], %s1961_s18, %s1961_s18, %s1962_s19  }
  0x1b   :  { %s1963_s25 = smov [#allocation11]   ;;  %s1964_s27 = smov [#allocation14]  }
  0x1c   :  { %s87_s26 = sshll.u32 %s1963_s25, 4  ;;  %s111_s28 = sshll.u32 %s1964_s27, 4  ;;  %s88_s26 = int_to_ptr.vmem [resolvable:$true] %s87_s26  ;;  %s112_s28 = int_to_ptr.vmem [resolvable:$true] %s111_s28 }
  0x1d   :  { %s1773_s1 = scalar_lea.vmem %s88_s26, 2048  ;;  %p1778_p11 = scmp.lt.s32.totalorder %s88_s26, %s88_s26 }
  0x1e   :  { %p1774_p10 = scmp.ne.s32.totalorder %s88_s26, %s1773_s1  ;;  %p1779_p12 = scmp.lt.s32.totalorder %s1773_s1, %s1773_s1 }
  0x20   :  { %p1780_p13 = por %p1779_p12, %p1778_p11 }
  0x22   :  { %p1781_p0 = pnand %p1780_p13, %p1774_p10 }
  0x24   :  { %1784 = shalt.err (!%p1781_p0)
}
  0x25   :  { %93 = dma.hbm_to_vmem [thread:$0]  %s2170_s5, 2048, %s88_s26, [#allocation12], %s1961_s18, %s1961_s18, %s1962_s19  }
  0x26   :  { %s1793_s3 = scalar_lea.vmem %s112_s28, 2048  ;;  %p1798_p2 = scmp.lt.s32.totalorder %s112_s28, %s112_s28 }
  0x27   :  { %p1794_p1 = scmp.ne.s32.totalorder %s112_s28, %s1793_s3  ;;  %p1799_p3 = scmp.lt.s32.totalorder %s1793_s3, %s1793_s3 }
  0x29   :  { %p1800_p4 = por %p1799_p3, %p1798_p2 }
  0x2b   :  { %p1801_p5 = pnand %p1800_p4, %p1794_p1 }
  0x2d   :  { %1804 = shalt.err (!%p1801_p5)
}
  0x2e   :  { %117 = dma.hbm_to_vmem [thread:$0]  %s2172_s7, 2048, %s112_s28, [#allocation15], %s1961_s18, %s1961_s18, %s1962_s19  }
  0x2f   :  { %s1965_s13 = smov [#allocation2]   ;;  %s1966_s15 = smov [#allocation7]  }
  0x30   :  { %s27_s14 = sshll.u32 %s1965_s13, 4  ;;  %s51_s16 = sshll.u32 %s1966_s15, 4  ;;  %s28_s14 = int_to_ptr.vmem [resolvable:$true] %s27_s14  ;;  %s52_s16 = int_to_ptr.vmem [resolvable:$true] %s51_s16 }
  0x31   :  { %s1813_s5 = scalar_lea.vmem %s28_s14, 256  ;;  %p1818_p7 = scmp.lt.s32.totalorder %s28_s14, %s28_s14 }
  0x32   :  { %p1814_p6 = scmp.ne.s32.totalorder %s28_s14, %s1813_s5  ;;  %p1819_p8 = scmp.lt.s32.totalorder %s1813_s5, %s1813_s5 }
  0x34   :  { %p1820_p9 = por %p1819_p8, %p1818_p7 }
  0x36   :  { %p1821_p10 = pnand %p1820_p9, %p1814_p6 }
  0x38   :  { %1824 = shalt.err (!%p1821_p10)
}
  0x39   :  { %33 = dma.hbm_to_vmem [thread:$0]  %s2165_s0, 256, %s28_s14, [#allocation3], %s1961_s18, %s1961_s18, %s1962_s19  }
  0x3a   :  { %s1833_s7 = scalar_lea.vmem %s52_s16, 2048  ;;  %p1838_p12 = scmp.lt.s32.totalorder %s52_s16, %s52_s16 }
  0x3b   :  { %p1834_p11 = scmp.ne.s32.totalorder %s52_s16, %s1833_s7  ;;  %p1839_p13 = scmp.lt.s32.totalorder %s1833_s7, %s1833_s7 }
  0x3d   :  { %p1840_p0 = por %p1839_p13, %p1838_p12 }
  0x3f   :  { %p1841_p1 = pnand %p1840_p0, %p1834_p11 }
  0x41   :  { %1844 = shalt.err (!%p1841_p1)
}
  0x42   :  { %57 = dma.hbm_to_vmem [thread:$0]  %s2167_s2, 2048, %s52_s16, [#allocation6], %s1961_s18, %s1961_s18, %s1962_s19  }
  0x43   :  { %s1967_s23 = smov [#allocation10]   ;;  %s1968_s25 = smov [#allocation13]  }
  0x44   :  { %s75_s24 = sshll.u32 %s1967_s23, 4  ;;  %s99_s26 = sshll.u32 %s1968_s25, 4  ;;  %s76_s24 = int_to_ptr.vmem [resolvable:$true] %s75_s24  ;;  %s100_s26 = int_to_ptr.vmem [resolvable:$true] %s99_s26 }
  0x45   :  { %s1853_s0 = scalar_lea.vmem %s76_s24, 2048  ;;  %p1858_p3 = scmp.lt.s32.totalorder %s76_s24, %s76_s24 }
  0x46   :  { %p1854_p2 = scmp.ne.s32.totalorder %s76_s24, %s1853_s0  ;;  %p1859_p4 = scmp.lt.s32.totalorder %s1853_s0, %s1853_s0 }
  0x48   :  { %p1860_p5 = por %p1859_p4, %p1858_p3 }
  0x4a   :  { %p1861_p6 = pnand %p1860_p5, %p1854_p2 }
  0x4c   :  { %1864 = shalt.err (!%p1861_p6)
}
  0x4d   :  { %81 = dma.hbm_to_vmem [thread:$0]  %s2169_s4, 2048, %s76_s24, [#allocation9], %s1961_s18, %s1961_s18, %s1962_s19  }
  0x4e   :  { %s1873_s2 = scalar_lea.vmem %s100_s26, 2048  ;;  %p1878_p8 = scmp.lt.s32.totalorder %s100_s26, %s100_s26 }
  0x4f   :  { %p1874_p7 = scmp.ne.s32.totalorder %s100_s26, %s1873_s2  ;;  %p1879_p9 = scmp.lt.s32.totalorder %s1873_s2, %s1873_s2 }
  0x51   :  { %p1880_p10 = por %p1879_p9, %p1878_p8 }
  0x53   :  { %p1881_p11 = pnand %p1880_p10, %p1874_p7 }
  0x55   :  { %1884 = shalt.err (!%p1881_p11)
}
  0x56   :  { %105 = dma.hbm_to_vmem [thread:$0]  %s2171_s6, 2048, %s100_s26, [#allocation12], %s1961_s18, %s1961_s18, %s1962_s19  }
  0x57   :  { %s1969_s30 = smov [#allocation16]   ;;  %s1970_s11 = smov [#allocation17]  }
  0x58   :  { %s123_s3 = sshll.u32 %s1969_s30, 4  ;;  %s135_s12 = sshll.u32 %s1970_s11, 4  ;;  %s124_s3 = int_to_ptr.vmem [resolvable:$true] %s123_s3  ;;  %s136_s12 = int_to_ptr.vmem [resolvable:$true] %s135_s12 }
  0x59   :  { %s1893_s4 = scalar_lea.vmem %s124_s3, 2048  ;;  %p1898_p13 = scmp.lt.s32.totalorder %s124_s3, %s124_s3 }
  0x5a   :  { %p1894_p12 = scmp.ne.s32.totalorder %s124_s3, %s1893_s4  ;;  %p1899_p0 = scmp.lt.s32.totalorder %s1893_s4, %s1893_s4 }
  0x5c   :  { %p1900_p1 = por %p1899_p0, %p1898_p13 }
  0x5e   :  { %p1901_p2 = pnand %p1900_p1, %p1894_p12 }
  0x60   :  { %1904 = shalt.err (!%p1901_p2)
}
  0x61   :  { %129 = dma.hbm_to_vmem [thread:$0]  %s2173_s8, 2048, %s124_s3, [#allocation15], %s1961_s18, %s1961_s18, %s1962_s19  }
  0x62   :  { %s1913_s6 = scalar_lea.vmem %s136_s12, 384  ;;  %p1918_p4 = scmp.lt.s32.totalorder %s136_s12, %s136_s12 }
  0x63   :  { %p1914_p3 = scmp.ne.s32.totalorder %s136_s12, %s1913_s6  ;;  %p1919_p5 = scmp.lt.s32.totalorder %s1913_s6, %s1913_s6 }
  0x65   :  { %p1920_p6 = por %p1919_p5, %p1918_p4 }
  0x67   :  { %p1921_p7 = pnand %p1920_p6, %p1914_p3 }
  0x69   :  { %1924 = shalt.err (!%p1921_p7)
}
  0x6a   :  { %141 = dma.hbm_to_vmem [thread:$0]  %s2174_s9, 384, %s136_s12, [#allocation18], %s1961_s18, %s1961_s18, %s1962_s19  }
  0x6b   :  { %1945 = dma.done.wait [#allocation3], 256  }
  0x6c   :  { %1946 = vsyncadd [#allocation3], 4294967040 }
  0x6d   :  { %1947 = dma.done.wait [#allocation6], 4096  }
  0x6e   :  { %1948 = vsyncadd [#allocation6], 4294963200 }
  0x6f   :  { %1949 = dma.done.wait [#allocation9], 4096  }
  0x70   :  { %1950 = vsyncadd [#allocation9], 4294963200 }
  0x71   :  { %1951 = dma.done.wait [#allocation12], 4096  }
  0x72   :  { %1952 = vsyncadd [#allocation12], 4294963200 }
  0x73   :  { %1953 = dma.done.wait [#allocation15], 4096  }
  0x74   :  { %1954 = vsyncadd [#allocation15], 4294963200 }
  0x75   :  { %1955 = dma.done.wait [#allocation18], 384  }
  0x76   :  { %1956 = vsyncadd [#allocation18], 4294966912  ;;  %v189_v0 = vld [vmem:[#allocation5 + $0x78] sm:$0xff]  ;;  %v188_v1 = vld [vmem:[#allocation5 + $0x70] sm:$0xff]  ;;  %s1971_s8 = smov [#allocation19]  }
  0x77   :  { %1404 = vmatprep.subr.mxu0 %v189_v0  ;;  %v187_v2 = vld [vmem:[#allocation5 + $0x68] sm:$0xff]  ;;  %v186_v3 = vld [vmem:[#allocation5 + $0x60] sm:$0xff]  ;;  %v172_v4 = vld [vmem:[#allocation2] sm:$0xff]  ;;  %s1223_s9 = sshll.u32 %s1971_s8, 4  ;;  %s1224_s9 = int_to_ptr.vmem [resolvable:$true] %s1223_s9 }
  0x78   :  { %1405 = vmatpush3.msra.mxu0 %v189_v0  ;;  %v185_v5 = vld [vmem:[#allocation5 + $0x58] sm:$0xff]  ;;  %1436 = vmatprep.mubr.f32.mxu0 %v172_v4  ;;  %v184_v6 = vld [vmem:[#allocation5 + $0x50] sm:$0xff]  ;;  %v183_v7 = vld [vmem:[#allocation5 + $0x48] sm:$0xff]  ;;  %s1925_s5 = scalar_lea.vmem %s1224_s9, 256  ;;  %p1930_p9 = scmp.lt.s32.totalorder %s1224_s9, %s1224_s9 }
  0x79   :  { %1406 = vmatprep.subr.mxu0 %v188_v1  ;;  %v182_v8 = vld [vmem:[#allocation5 + $0x40] sm:$0xff]  ;;  %v181_v9 = vld [vmem:[#allocation5 + $0x38] sm:$0xff]  ;;  %v180_v10 = vld [vmem:[#allocation5 + $0x30] sm:$0xff]  ;;  %p1926_p8 = scmp.ne.s32.totalorder %s1224_s9, %s1925_s5  ;;  %p1931_p10 = scmp.lt.s32.totalorder %s1925_s5, %s1925_s5 }
  0x7a   :  { %1407 = vmatpush3.msra.mxu0 %v188_v1  ;;  %v179_v11 = vld [vmem:[#allocation5 + $0x28] sm:$0xff]  ;;  %v178_v12 = vld [vmem:[#allocation5 + $0x20] sm:$0xff]  ;;  %v177_v13 = vld [vmem:[#allocation5 + $0x18] sm:$0xff] }
  0x7b   :  { %1408 = vmatprep.subr.mxu0 %v187_v2  ;;  %v176_v14 = vld [vmem:[#allocation5 + $0x10] sm:$0xff]  ;;  %v175_v15 = vld [vmem:[#allocation5 + $0x8] sm:$0xff]  ;;  %v174_v16 = vld [vmem:[#allocation5] sm:$0xff]  ;;  %p1932_p11 = por %p1931_p10, %p1930_p9 }
  0x7c   :  { %1409 = vmatpush3.msra.mxu0 %v187_v2  ;;  %v173_v17 = vld [vmem:[#allocation2 + $0x8] sm:$0xff]  ;;  %v1240_v19 = vld [vmem:[#allocation17] ss:$0 sm:$0xff]  ;;  %v328_v26 = vld [vmem:[#allocation7 + $0x70] sm:$0xff] }
  0x7d   :  { %1410 = vmatprep.subr.mxu0 %v186_v3  ;;  %v329_v25 = vld [vmem:[#allocation7 + $0x78] sm:$0xff]  ;;  %v327_v27 = vld [vmem:[#allocation7 + $0x68] sm:$0xff]  ;;  %v326_v28 = vld [vmem:[#allocation7 + $0x60] sm:$0xff]  ;;  %p1933_p12 = pnand %p1932_p11, %p1926_p8 }
  0x7e   :  { %1411 = vmatpush3.msra.mxu0 %v186_v3  ;;  %1439 = vmatprep.subr.mxu1 %v329_v25  ;;  %v325_v29 = vld [vmem:[#allocation7 + $0x58] sm:$0xff]  ;;  %v324_v30 = vld [vmem:[#allocation7 + $0x50] sm:$0xff]  ;;  %v323_v31 = vld [vmem:[#allocation7 + $0x48] sm:$0xff] }
  0x7f   :  { %1412 = vmatprep.subr.mxu0 %v185_v5  ;;  %1440 = vmatpush3.msra.mxu1 %v329_v25  ;;  %v322_v32 = vld [vmem:[#allocation7 + $0x40] sm:$0xff]  ;;  %v321_v33 = vld [vmem:[#allocation7 + $0x38] sm:$0xff]  ;;  %v320_v34 = vld [vmem:[#allocation7 + $0x30] sm:$0xff] }
  0x80   :  { %1413 = vmatpush3.msra.mxu0 %v185_v5  ;;  %1441 = vmatprep.subr.mxu1 %v328_v26  ;;  %v319_v35 = vld [vmem:[#allocation7 + $0x28] sm:$0xff]  ;;  %v318_v36 = vld [vmem:[#allocation7 + $0x20] sm:$0xff]  ;;  %v317_v37 = vld [vmem:[#allocation7 + $0x18] sm:$0xff] }
  0x81   :  { %1414 = vmatprep.subr.mxu0 %v184_v6  ;;  %1442 = vmatpush3.msra.mxu1 %v328_v26  ;;  %v316_v38 = vld [vmem:[#allocation7 + $0x10] sm:$0xff]  ;;  %v315_v39 = vld [vmem:[#allocation7 + $0x8] sm:$0xff]  ;;  %v314_v40 = vld [vmem:[#allocation7] sm:$0xff] }
  0x82   :  { %1415 = vmatpush3.msra.mxu0 %v184_v6  ;;  %1443 = vmatprep.subr.mxu1 %v327_v27  ;;  %v1241_v59 = vld [vmem:[#allocation17 + $0x1] ss:$0 sm:$0xff]  ;;  %v1242_v61 = vld [vmem:[#allocation17 + $0x2] ss:$0 sm:$0xff]  ;;  %v457_v26 = vld [vmem:[#allocation8 + $0x18] sm:$0xff] }
  0x83   :  { %1416 = vmatprep.subr.mxu0 %v183_v7  ;;  %1444 = vmatpush3.msra.mxu1 %v327_v27  ;;  %v458_v25 = vld [vmem:[#allocation8 + $0x20] sm:$0xff]  ;;  %v456_v27 = vld [vmem:[#allocation8 + $0x10] sm:$0xff] }
  0x84   :  { %1417 = vmatpush3.msra.mxu0 %v183_v7  ;;  %1445 = vmatprep.subr.mxu1 %v326_v28  ;;  %v1243_v7 = vld [vmem:[#allocation17 + $0x3] ss:$0 sm:$0xff] }
  0x85   :  { %1418 = vmatprep.subr.mxu0 %v182_v8  ;;  %1446 = vmatpush3.msra.mxu1 %v326_v28  ;;  %v455_v28 = vld [vmem:[#allocation8 + $0x8] sm:$0xff] }
  0x86   :  { %1419 = vmatpush3.msra.mxu0 %v182_v8  ;;  %1447 = vmatprep.subr.mxu1 %v325_v29 }
  0x87   :  { %1420 = vmatprep.subr.mxu0 %v181_v9  ;;  %1448 = vmatpush3.msra.mxu1 %v325_v29  ;;  %v454_v29 = vld [vmem:[#allocation8] sm:$0xff] }
  0x88   :  { %1421 = vmatpush3.msra.mxu0 %v181_v9  ;;  %1449 = vmatprep.subr.mxu1 %v324_v30 }
  0x89   :  { %1422 = vmatprep.subr.mxu0 %v180_v10  ;;  %1450 = vmatpush3.msra.mxu1 %v324_v30 }
  0x8a   :  { %1423 = vmatpush3.msra.mxu0 %v180_v10  ;;  %1451 = vmatprep.subr.mxu1 %v323_v31 }
  0x8b   :  { %1424 = vmatprep.subr.mxu0 %v179_v11  ;;  %1452 = vmatpush3.msra.mxu1 %v323_v31 }
  0x8c   :  { %1425 = vmatpush3.msra.mxu0 %v179_v11  ;;  %1453 = vmatprep.subr.mxu1 %v322_v32 }
  0x8d   :  { %1426 = vmatprep.subr.mxu0 %v178_v12  ;;  %1454 = vmatpush3.msra.mxu1 %v322_v32 }
  0x8e   :  { %1427 = vmatpush3.msra.mxu0 %v178_v12  ;;  %1455 = vmatprep.subr.mxu1 %v321_v33 }
  0x8f   :  { %1428 = vmatprep.subr.mxu0 %v177_v13  ;;  %1456 = vmatpush3.msra.mxu1 %v321_v33 }
  0x90   :  { %1429 = vmatpush3.msra.mxu0 %v177_v13  ;;  %1457 = vmatprep.subr.mxu1 %v320_v34 }
  0x91   :  { %1430 = vmatprep.subr.mxu0 %v176_v14  ;;  %1458 = vmatpush3.msra.mxu1 %v320_v34 }
  0x92   :  { %1431 = vmatpush3.msra.mxu0 %v176_v14  ;;  %1459 = vmatprep.subr.mxu1 %v319_v35  ;;  %v469_v14 = vld [vmem:[#allocation8 + $0x78] sm:$0xff] }
  0x93   :  { %1432 = vmatprep.subr.mxu0 %v175_v15  ;;  %1460 = vmatpush3.msra.mxu1 %v319_v35 }
  0x94   :  { %1433 = vmatpush3.msra.mxu0 %v175_v15  ;;  %1461 = vmatprep.subr.mxu1 %v318_v36  ;;  %v468_v15 = vld [vmem:[#allocation8 + $0x70] sm:$0xff] }
  0x95   :  { %1434 = vmatprep.subr.mxu0 %v174_v16  ;;  %1462 = vmatpush3.msra.mxu1 %v318_v36 }
  0x96   :  { %1435 = vmatpush3.msra.mxu0 %v174_v16  ;;  %1463 = vmatprep.subr.mxu1 %v317_v37  ;;  %v467_v16 = vld [vmem:[#allocation8 + $0x68] sm:$0xff] }
  0x97   :  { %1437 = vmatmul.mubr.f32.vlgmr.msra.gmra.mxu0 %v173_v17  ;;  %1464 = vmatpush3.msra.mxu1 %v317_v37  ;;  %v466_v17 = vld [vmem:[#allocation8 + $0x60] sm:$0xff] }
  0x98   :  { %1465 = vmatprep.subr.mxu1 %v316_v38  ;;  %1474 = vmatprep.subr.mxu0 %v469_v14 }
  0x99   :  { %1466 = vmatpush3.msra.mxu1 %v316_v38  ;;  %1475 = vmatpush3.msra.mxu0 %v469_v14  ;;  %v598_v14 = vld [vmem:[#allocation10 + $0x20] sm:$0xff] }
  0x9a   :  { %1467 = vmatprep.subr.mxu1 %v315_v39  ;;  %1476 = vmatprep.subr.mxu0 %v468_v15 }
  0x9b   :  { %1468 = vmatpush3.msra.mxu1 %v315_v39  ;;  %1477 = vmatpush3.msra.mxu0 %v468_v15  ;;  %v597_v15 = vld [vmem:[#allocation10 + $0x18] sm:$0xff] }
  0x9c   :  { %1469 = vmatprep.subr.mxu1 %v314_v40  ;;  %1478 = vmatprep.subr.mxu0 %v467_v16 }
  0x9d   :  { %1470 = vmatpush3.msra.mxu1 %v314_v40  ;;  %1479 = vmatpush3.msra.mxu0 %v467_v16  ;;  %v596_v16 = vld [vmem:[#allocation10 + $0x10] sm:$0xff] }
  0x9e   :  { %1480 = vmatprep.subr.mxu0 %v466_v17 }
  0x9f   :  { %1481 = vmatpush3.msra.mxu0 %v466_v17  ;;  %v595_v17 = vld [vmem:[#allocation10 + $0x8] sm:$0xff] }
 0x157   :  { %v1438_v18 = vpop.f32.mrf.mxu0 }
 0x158   :  { %v2089_v22 = vadd.f32 %v1438_v18, %v1240_v19  ;;  %v465_v18 = vld [vmem:[#allocation8 + $0x58] sm:$0xff] }
 0x159   :  { %v261_v20 = vpop.f32.mrf.mxu0  ;;  %1482 = vmatprep.subr.mxu0 %v465_v18 }
 0x15a   :  { %v2087_v21 = vadd.f32 %v1240_v19, %v261_v20  ;;  %v277_v24 = vmul.f32 %v2089_v22, %v2089_v22  ;;  %1483 = vmatpush3.msra.mxu0 %v465_v18  ;;  %v464_v19 = vld [vmem:[#allocation8 + $0x50] sm:$0xff]  ;;  %v463_v20 = vld [vmem:[#allocation8 + $0x48] sm:$0xff]  ;;  %v594_v18 = vld [vmem:[#allocation10] sm:$0xff] }
 0x15b   :  { %1484 = vmatprep.subr.mxu0 %v464_v19 }
 0x15c   :  { %272 = vadd.xlane.f32.xlu0 %v2087_v21  ;;  %v276_v23 = vmul.f32 %v2087_v21, %v2087_v21  ;;  %1485 = vmatpush3.msra.mxu0 %v464_v19  ;;  %v707_v19 = vld [vmem:[#allocation11 + $0x78] sm:$0xff] }
 0x15d   :  { %1486 = vmatprep.subr.mxu0 %v463_v20 }
 0x15e   :  { %278 = vadd.xlane.f32.xlu1 %v276_v23  ;;  %1487 = vmatpush3.msra.mxu0 %v463_v20  ;;  %v460_v23 = vld [vmem:[#allocation8 + $0x30] sm:$0xff] }
 0x15f   :  { %v706_v20 = vld [vmem:[#allocation11 + $0x70] sm:$0xff] }
 0x160   :  { %274 = vadd.xlane.f32.xlu0 %v2089_v22 }
 0x162   :  { %280 = vadd.xlane.f32.xlu1 %v277_v24  ;;  %v459_v24 = vld [vmem:[#allocation8 + $0x28] sm:$0xff] }
 0x1e5   :  { %v273_v41 = vpop.xlane.xlu0 %272 }
 0x1e6   :  { %v282_v42 = vmul.f32 0.03125, %v273_v41 }
 0x1e7   :  { %v279_v43 = vpop.xlane.xlu1 %278 }
 0x1e8   :  { %v286_v44 = vmul.f32 %v282_v42, %v282_v42  ;;  %v284_v45 = vmul.f32 0.03125, %v279_v43  ;;  %v296_v57 = vsub.f32 %v2087_v21, %v282_v42  ;;  %v462_v21 = vld [vmem:[#allocation8 + $0x40] sm:$0xff] }
 0x1e9   :  { %v275_v46 = vpop.xlane.xlu0 %274  ;;  %1488 = vmatprep.subr.mxu0 %v462_v21 }
 0x1ea   :  { %v288_v47 = vsub.f32 %v284_v45, %v286_v44  ;;  %v283_v48 = vmul.f32 0.03125, %v275_v46  ;;  %1489 = vmatpush3.msra.mxu0 %v462_v21  ;;  %v705_v21 = vld [vmem:[#allocation11 + $0x68] sm:$0xff] }
 0x1eb   :  { %v281_v49 = vpop.xlane.xlu1 %280 }
 0x1ec   :  { %v290_v50 = vmax.f32 %v288_v47, 0.0  ;;  %v287_v51 = vmul.f32 %v283_v48, %v283_v48  ;;  %v285_v52 = vmul.f32 0.03125, %v281_v49  ;;  %v297_v62 = vsub.f32 %v2089_v22, %v283_v48  ;;  %v461_v22 = vld [vmem:[#allocation8 + $0x38] sm:$0xff]  ;;  %v1244_v48 = vld [vmem:[#allocation17 + $0x4] ss:$0 sm:$0xff] }
 0x1ed   :  { %1490 = vmatprep.subr.mxu0 %v461_v22 }
 0x1ee   :  { %v292_v53 = vadd.f32 1e-05, %v290_v50  ;;  %v289_v54 = vsub.f32 %v285_v52, %v287_v51  ;;  %1491 = vmatpush3.msra.mxu0 %v461_v22  ;;  %v1245_v52 = vld [vmem:[#allocation17 + $0x5] ss:$0 sm:$0xff] }
 0x1ef   :  { %1492 = vmatprep.subr.mxu0 %v460_v23  ;;  %v704_v22 = vld [vmem:[#allocation11 + $0x60] sm:$0xff] }
 0x1f0   :  { %1697 = vrsqrt.f32 %v292_v53  ;;  %v291_v55 = vmax.f32 %v289_v54, 0.0  ;;  %1493 = vmatpush3.msra.mxu0 %v460_v23  ;;  %v703_v23 = vld [vmem:[#allocation11 + $0x58] sm:$0xff] }
 0x1f1   :  { %1494 = vmatprep.subr.mxu0 %v459_v24 }
 0x1f2   :  { %v293_v56 = vadd.f32 1e-05, %v291_v55  ;;  %1495 = vmatpush3.msra.mxu0 %v459_v24  ;;  %v702_v24 = vld [vmem:[#allocation11 + $0x50] sm:$0xff] }
 0x1f3   :  { %1496 = vmatprep.subr.mxu0 %v458_v25 }
 0x1f4   :  { %1699 = vrsqrt.f32 %v293_v56  ;;  %1497 = vmatpush3.msra.mxu0 %v458_v25  ;;  %v701_v25 = vld [vmem:[#allocation11 + $0x48] sm:$0xff] }
 0x1f5   :  { %1498 = vmatprep.subr.mxu0 %v457_v26 }
 0x1f6   :  { %1499 = vmatpush3.msra.mxu0 %v457_v26  ;;  %v700_v26 = vld [vmem:[#allocation11 + $0x40] sm:$0xff] }
 0x1f7   :  { %1500 = vmatprep.subr.mxu0 %v456_v27 }
 0x1f8   :  { %1501 = vmatpush3.msra.mxu0 %v456_v27  ;;  %v699_v27 = vld [vmem:[#allocation11 + $0x38] sm:$0xff] }
 0x1f9   :  { %1502 = vmatprep.subr.mxu0 %v455_v28 }
 0x1fa   :  { %1503 = vmatpush3.msra.mxu0 %v455_v28  ;;  %v698_v28 = vld [vmem:[#allocation11 + $0x30] sm:$0xff] }
 0x1fb   :  { %1504 = vmatprep.subr.mxu0 %v454_v29 }
 0x1fc   :  { %1505 = vmatpush3.msra.mxu0 %v454_v29  ;;  %v697_v29 = vld [vmem:[#allocation11 + $0x28] sm:$0xff] }
 0x1fd   :  { %v1698_v58 = vpop.eup %1697  ;;  %1544 = vmatprep.subr.mxu0 %v707_v19 }
 0x1fe   :  { %v298_v60 = vmul.f32 %v1698_v58, %v296_v57 }
 0x200   :  { %v304_v63 = vmul.f32 %v1241_v59, %v298_v60  ;;  %v1246_v60 = vld [vmem:[#allocation17 + $0x6] ss:$0 sm:$0xff] }
 0x201   :  { %v1700_v0 = vpop.eup %1699 }
 0x202   :  { %v299_v1 = vmul.f32 %v1700_v0, %v297_v62  ;;  %v310_v2 = vadd.f32 %v1242_v61, %v304_v63 }
 0x204   :  { %v305_v3 = vmul.f32 %v1241_v59, %v299_v1  ;;  %v312_v4 = vmax.f32 %v310_v2, 0.0 }
 0x206   :  { %v311_v5 = vadd.f32 %v1242_v61, %v305_v3  ;;  %1471 = vmatprep.mubr.f32.mxu1 %v312_v4  ;;  %v609_v3 = vld [vmem:[#allocation10 + $0x78] sm:$0xff]  ;;  %v608_v4 = vld [vmem:[#allocation10 + $0x70] sm:$0xff] }
 0x207   :  { %1509 = vmatprep.subr.mxu1 %v609_v3 }
 0x208   :  { %v313_v6 = vmax.f32 %v311_v5, 0.0  ;;  %v607_v5 = vld [vmem:[#allocation10 + $0x68] sm:$0xff] }
 0x20a   :  { %1472 = vmatmul.mubr.f32.vlgmr.msra.gmra.mxu1 %v313_v6  ;;  %v606_v6 = vld [vmem:[#allocation10 + $0x60] sm:$0xff] }
 0x20b   :  { %1510 = vmatpush3.msra.mxu1 %v609_v3 }
 0x20c   :  { %1511 = vmatprep.subr.mxu1 %v608_v4 }
 0x20d   :  { %1512 = vmatpush3.msra.mxu1 %v608_v4 }
 0x20e   :  { %1513 = vmatprep.subr.mxu1 %v607_v5 }
 0x20f   :  { %1514 = vmatpush3.msra.mxu1 %v607_v5 }
 0x210   :  { %1515 = vmatprep.subr.mxu1 %v606_v6 }
 0x211   :  { %1516 = vmatpush3.msra.mxu1 %v606_v6 }
 0x2ca   :  { %v1473_v8 = vpop.f32.mrf.mxu1 }
 0x2cb   :  { %v2099_v9 = vadd.f32 %v1473_v8, %v1243_v7  ;;  %v604_v8 = vld [vmem:[#allocation10 + $0x50] sm:$0xff] }
 0x2cc   :  { %v401_v10 = vpop.f32.mrf.mxu1 }
 0x2cd   :  { %v2101_v11 = vadd.f32 %v1243_v7, %v401_v10  ;;  %414 = vadd.xlane.f32.xlu1 %v2099_v9  ;;  %v417_v12 = vmul.f32 %v2099_v9, %v2099_v9  ;;  %v605_v7 = vld [vmem:[#allocation10 + $0x58] sm:$0xff]  ;;  %v602_v10 = vld [vmem:[#allocation10 + $0x40] sm:$0xff] }
 0x2ce   :  { %1517 = vmatprep.subr.mxu1 %v605_v7 }
 0x2cf   :  { %412 = vadd.xlane.f32.xlu0 %v2101_v11  ;;  %v416_v13 = vmul.f32 %v2101_v11, %v2101_v11  ;;  %1518 = vmatpush3.msra.mxu1 %v605_v7 }
 0x2d0   :  { %1519 = vmatprep.subr.mxu1 %v604_v8 }
 0x2d1   :  { %420 = vadd.xlane.f32.xlu1 %v417_v12  ;;  %1520 = vmatpush3.msra.mxu1 %v604_v8  ;;  %v600_v12 = vld [vmem:[#allocation10 + $0x30] sm:$0xff]  ;;  %v1250_v8 = vld [vmem:[#allocation17 + $0xa] ss:$0 sm:$0xff] }
 0x2d3   :  { %418 = vadd.xlane.f32.xlu0 %v416_v13  ;;  %v599_v13 = vld [vmem:[#allocation10 + $0x28] sm:$0xff] }
 0x356   :  { %v415_v30 = vpop.xlane.xlu1 %414 }
 0x357   :  { %v423_v31 = vmul.f32 0.015625, %v415_v30  ;;  %v696_v30 = vld [vmem:[#allocation11 + $0x20] sm:$0xff] }
 0x358   :  { %v413_v32 = vpop.xlane.xlu0 %412 }
 0x359   :  { %v422_v33 = vmul.f32 0.015625, %v413_v32  ;;  %v427_v35 = vmul.f32 %v423_v31, %v423_v31  ;;  %v437_v46 = vsub.f32 %v2099_v9, %v423_v31  ;;  %v603_v9 = vld [vmem:[#allocation10 + $0x48] sm:$0xff] }
 0x35a   :  { %v421_v34 = vpop.xlane.xlu1 %420  ;;  %1521 = vmatprep.subr.mxu1 %v603_v9 }
 0x35b   :  { %v425_v36 = vmul.f32 0.015625, %v421_v34  ;;  %v426_v38 = vmul.f32 %v422_v33, %v422_v33  ;;  %v436_v49 = vsub.f32 %v2101_v11, %v422_v33  ;;  %1522 = vmatpush3.msra.mxu1 %v603_v9  ;;  %v601_v11 = vld [vmem:[#allocation10 + $0x38] sm:$0xff] }
 0x35c   :  { %v419_v37 = vpop.xlane.xlu0 %418  ;;  %1523 = vmatprep.subr.mxu1 %v602_v10 }
 0x35d   :  { %v429_v39 = vsub.f32 %v425_v36, %v427_v35  ;;  %v424_v40 = vmul.f32 0.015625, %v419_v37  ;;  %1524 = vmatpush3.msra.mxu1 %v602_v10 }
 0x35e   :  { %1525 = vmatprep.subr.mxu1 %v601_v11 }
 0x35f   :  { %v431_v41 = vmax.f32 %v429_v39, 0.0  ;;  %v428_v42 = vsub.f32 %v424_v40, %v426_v38  ;;  %1526 = vmatpush3.msra.mxu1 %v601_v11 }
 0x360   :  { %1527 = vmatprep.subr.mxu1 %v600_v12 }
 0x361   :  { %v433_v43 = vadd.f32 1e-05, %v431_v41  ;;  %v430_v44 = vmax.f32 %v428_v42, 0.0  ;;  %1528 = vmatpush3.msra.mxu1 %v600_v12 }
 0x362   :  { %1529 = vmatprep.subr.mxu1 %v599_v13 }
 0x363   :  { %1701 = vrsqrt.f32 %v433_v43  ;;  %v432_v45 = vadd.f32 1e-05, %v430_v44  ;;  %1530 = vmatpush3.msra.mxu1 %v599_v13 }
 0x364   :  { %1531 = vmatprep.subr.mxu1 %v598_v14 }
 0x365   :  { %1703 = vrsqrt.f32 %v432_v45  ;;  %1532 = vmatpush3.msra.mxu1 %v598_v14 }
 0x366   :  { %1533 = vmatprep.subr.mxu1 %v597_v15 }
 0x367   :  { %1534 = vmatpush3.msra.mxu1 %v597_v15  ;;  %v847_v15 = vld [vmem:[#allocation13 + $0x78] sm:$0xff] }
 0x368   :  { %1535 = vmatprep.subr.mxu1 %v596_v16 }
 0x369   :  { %1536 = vmatpush3.msra.mxu1 %v596_v16  ;;  %v846_v16 = vld [vmem:[#allocation13 + $0x70] sm:$0xff] }
 0x36a   :  { %1537 = vmatprep.subr.mxu1 %v595_v17 }
 0x36b   :  { %1538 = vmatpush3.msra.mxu1 %v595_v17  ;;  %v845_v17 = vld [vmem:[#allocation13 + $0x68] sm:$0xff] }
 0x36c   :  { %1539 = vmatprep.subr.mxu1 %v594_v18 }
 0x36d   :  { %1540 = vmatpush3.msra.mxu1 %v594_v18  ;;  %v844_v18 = vld [vmem:[#allocation13 + $0x60] sm:$0xff] }
 0x36e   :  { %1579 = vmatprep.subr.mxu1 %v847_v15 }
 0x370   :  { %v1702_v47 = vpop.eup %1701 }
 0x371   :  { %v439_v50 = vmul.f32 %v1702_v47, %v437_v46 }
 0x372   :  { %v1704_v51 = vpop.eup %1703 }
 0x373   :  { %v438_v53 = vmul.f32 %v1704_v51, %v436_v49  ;;  %v445_v54 = vmul.f32 %v1244_v48, %v439_v50  ;;  %v1247_v49 = vld [vmem:[#allocation17 + $0x7] ss:$0 sm:$0xff] }
 0x375   :  { %v444_v55 = vmul.f32 %v1244_v48, %v438_v53  ;;  %v451_v56 = vadd.f32 %v1245_v52, %v445_v54  ;;  %v1248_v53 = vld [vmem:[#allocation17 + $0x8] ss:$0 sm:$0xff] }
 0x377   :  { %v450_v57 = vadd.f32 %v1245_v52, %v444_v55  ;;  %v453_v59 = vmax.f32 %v451_v56, 0.0 }
 0x379   :  { %v452_v58 = vmax.f32 %v450_v57, 0.0 }
 0x37b   :  { %1506 = vmatprep.mubr.f32.mxu0 %v452_v58 }
 0x37c   :  { %1507 = vmatmul.mubr.f32.vlgmr.msra.gmra.mxu0 %v453_v59 }
 0x37d   :  { %1545 = vmatpush3.msra.mxu0 %v707_v19  ;;  %v843_v19 = vld [vmem:[#allocation13 + $0x58] sm:$0xff] }
 0x37e   :  { %1546 = vmatprep.subr.mxu0 %v706_v20 }
 0x37f   :  { %1547 = vmatpush3.msra.mxu0 %v706_v20  ;;  %v842_v20 = vld [vmem:[#allocation13 + $0x50] sm:$0xff] }
 0x380   :  { %1548 = vmatprep.subr.mxu0 %v705_v21 }
 0x381   :  { %1549 = vmatpush3.msra.mxu0 %v705_v21  ;;  %v841_v21 = vld [vmem:[#allocation13 + $0x48] sm:$0xff] }
 0x382   :  { %1550 = vmatprep.subr.mxu0 %v704_v22 }
 0x383   :  { %1551 = vmatpush3.msra.mxu0 %v704_v22  ;;  %v840_v22 = vld [vmem:[#allocation13 + $0x40] sm:$0xff] }
 0x384   :  { %1552 = vmatprep.subr.mxu0 %v703_v23 }
 0x385   :  { %1553 = vmatpush3.msra.mxu0 %v703_v23  ;;  %v839_v23 = vld [vmem:[#allocation13 + $0x38] sm:$0xff] }
 0x386   :  { %1554 = vmatprep.subr.mxu0 %v702_v24 }
 0x387   :  { %1555 = vmatpush3.msra.mxu0 %v702_v24  ;;  %v838_v24 = vld [vmem:[#allocation13 + $0x30] sm:$0xff] }
 0x388   :  { %1556 = vmatprep.subr.mxu0 %v701_v25 }
 0x389   :  { %1557 = vmatpush3.msra.mxu0 %v701_v25  ;;  %v837_v25 = vld [vmem:[#allocation13 + $0x28] sm:$0xff] }
 0x38a   :  { %1558 = vmatprep.subr.mxu0 %v700_v26 }
 0x38b   :  { %1559 = vmatpush3.msra.mxu0 %v700_v26  ;;  %v836_v26 = vld [vmem:[#allocation13 + $0x20] sm:$0xff] }
 0x38c   :  { %1560 = vmatprep.subr.mxu0 %v699_v27 }
 0x38d   :  { %1561 = vmatpush3.msra.mxu0 %v699_v27  ;;  %v835_v27 = vld [vmem:[#allocation13 + $0x18] sm:$0xff] }
 0x38e   :  { %1562 = vmatprep.subr.mxu0 %v698_v28 }
 0x38f   :  { %1563 = vmatpush3.msra.mxu0 %v698_v28  ;;  %v834_v28 = vld [vmem:[#allocation13 + $0x10] sm:$0xff] }
 0x390   :  { %1564 = vmatprep.subr.mxu0 %v697_v29 }
 0x391   :  { %1565 = vmatpush3.msra.mxu0 %v697_v29  ;;  %v833_v29 = vld [vmem:[#allocation13 + $0x8] sm:$0xff] }
 0x392   :  { %1566 = vmatprep.subr.mxu0 %v696_v30 }
 0x393   :  { %1567 = vmatpush3.msra.mxu0 %v696_v30  ;;  %v832_v30 = vld [vmem:[#allocation13] sm:$0xff] }
 0x43c   :  { %v1508_v61 = vpop.f32.mrf.mxu0 }
 0x43d   :  { %v2111_v62 = vadd.f32 %v1508_v61, %v1246_v60  ;;  %v695_v61 = vld [vmem:[#allocation11 + $0x18] sm:$0xff] }
 0x43e   :  { %v541_v63 = vpop.f32.mrf.mxu0  ;;  %1568 = vmatprep.subr.mxu0 %v695_v61 }
 0x43f   :  { %v2113_v0 = vadd.f32 %v1246_v60, %v541_v63  ;;  %554 = vadd.xlane.f32.xlu1 %v2111_v62  ;;  %v557_v1 = vmul.f32 %v2111_v62, %v2111_v62  ;;  %1569 = vmatpush3.msra.mxu0 %v695_v61  ;;  %v693_v63 = vld [vmem:[#allocation11 + $0x8] sm:$0xff] }
 0x440   :  { %v1253_v61 = vld [vmem:[#allocation17 + $0xd] ss:$0 sm:$0xff] }
 0x441   :  { %552 = vadd.xlane.f32.xlu0 %v2113_v0  ;;  %v556_v2 = vmul.f32 %v2113_v0, %v2113_v0 }
 0x443   :  { %560 = vadd.xlane.f32.xlu1 %v557_v1  ;;  %v1249_v1 = vld [vmem:[#allocation17 + $0x9] ss:$0 sm:$0xff] }
 0x445   :  { %558 = vadd.xlane.f32.xlu0 %v556_v2 }
 0x4c8   :  { %v555_v31 = vpop.xlane.xlu1 %554 }
 0x4c9   :  { %v563_v32 = vmul.f32 0.0078125, %v555_v31 }
 0x4ca   :  { %v553_v33 = vpop.xlane.xlu0 %552 }
 0x4cb   :  { %v562_v34 = vmul.f32 0.0078125, %v553_v33  ;;  %v567_v36 = vmul.f32 %v563_v32, %v563_v32  ;;  %v577_v47 = vsub.f32 %v2111_v62, %v563_v32  ;;  %v694_v62 = vld [vmem:[#allocation11 + $0x10] sm:$0xff] }
 0x4cc   :  { %v561_v35 = vpop.xlane.xlu1 %560  ;;  %1570 = vmatprep.subr.mxu0 %v694_v62 }
 0x4cd   :  { %v565_v37 = vmul.f32 0.0078125, %v561_v35  ;;  %v566_v39 = vmul.f32 %v562_v34, %v562_v34  ;;  %v576_v50 = vsub.f32 %v2113_v0, %v562_v34  ;;  %1571 = vmatpush3.msra.mxu0 %v694_v62  ;;  %v692_v0 = vld [vmem:[#allocation11] sm:$0xff] }
 0x4ce   :  { %v559_v38 = vpop.xlane.xlu0 %558  ;;  %1572 = vmatprep.subr.mxu0 %v693_v63 }
 0x4cf   :  { %v569_v40 = vsub.f32 %v565_v37, %v567_v36  ;;  %v564_v41 = vmul.f32 0.0078125, %v559_v38  ;;  %1573 = vmatpush3.msra.mxu0 %v693_v63 }
 0x4d0   :  { %1574 = vmatprep.subr.mxu0 %v692_v0 }
 0x4d1   :  { %v571_v42 = vmax.f32 %v569_v40, 0.0  ;;  %v568_v43 = vsub.f32 %v564_v41, %v566_v39  ;;  %1575 = vmatpush3.msra.mxu0 %v692_v0 }
 0x4d3   :  { %v573_v44 = vadd.f32 1e-05, %v571_v42  ;;  %v570_v45 = vmax.f32 %v568_v43, 0.0 }
 0x4d5   :  { %1705 = vrsqrt.f32 %v573_v44  ;;  %v572_v46 = vadd.f32 1e-05, %v570_v45 }
 0x4d7   :  { %1707 = vrsqrt.f32 %v572_v46 }
 0x4e2   :  { %v1706_v48 = vpop.eup %1705 }
 0x4e3   :  { %v579_v51 = vmul.f32 %v1706_v48, %v577_v47 }
 0x4e4   :  { %v1708_v52 = vpop.eup %1707 }
 0x4e5   :  { %v578_v54 = vmul.f32 %v1708_v52, %v576_v50  ;;  %v585_v55 = vmul.f32 %v1247_v49, %v579_v51 }
 0x4e7   :  { %v584_v56 = vmul.f32 %v1247_v49, %v578_v54  ;;  %v591_v57 = vadd.f32 %v1248_v53, %v585_v55  ;;  %v1251_v49 = vld [vmem:[#allocation17 + $0xb] ss:$0 sm:$0xff] }
 0x4e9   :  { %v590_v58 = vadd.f32 %v1248_v53, %v584_v56  ;;  %v593_v60 = vmax.f32 %v591_v57, 0.0  ;;  %v1252_v53 = vld [vmem:[#allocation17 + $0xc] ss:$0 sm:$0xff] }
 0x4eb   :  { %v592_v59 = vmax.f32 %v590_v58, 0.0 }
 0x4ed   :  { %1541 = vmatprep.mubr.f32.mxu1 %v592_v59 }
 0x4ee   :  { %1542 = vmatmul.mubr.f32.vlgmr.msra.gmra.mxu1 %v593_v60 }
 0x4ef   :  { %1580 = vmatpush3.msra.mxu1 %v847_v15  ;;  %v976_v15 = vld [vmem:[#allocation14 + $0x20] sm:$0xff] }
 0x4f0   :  { %1581 = vmatprep.subr.mxu1 %v846_v16 }
 0x4f1   :  { %1582 = vmatpush3.msra.mxu1 %v846_v16  ;;  %v975_v16 = vld [vmem:[#allocation14 + $0x18] sm:$0xff] }
 0x4f2   :  { %1583 = vmatprep.subr.mxu1 %v845_v17 }
 0x4f3   :  { %1584 = vmatpush3.msra.mxu1 %v845_v17  ;;  %v974_v17 = vld [vmem:[#allocation14 + $0x10] sm:$0xff] }
 0x4f4   :  { %1585 = vmatprep.subr.mxu1 %v844_v18 }
 0x4f5   :  { %1586 = vmatpush3.msra.mxu1 %v844_v18  ;;  %v973_v18 = vld [vmem:[#allocation14 + $0x8] sm:$0xff] }
 0x4f6   :  { %1587 = vmatprep.subr.mxu1 %v843_v19 }
 0x4f7   :  { %1588 = vmatpush3.msra.mxu1 %v843_v19  ;;  %v972_v19 = vld [vmem:[#allocation14] sm:$0xff] }
 0x4f8   :  { %1589 = vmatprep.subr.mxu1 %v842_v20 }
 0x4f9   :  { %1590 = vmatpush3.msra.mxu1 %v842_v20 }
 0x4fa   :  { %1591 = vmatprep.subr.mxu1 %v841_v21 }
 0x4fb   :  { %1592 = vmatpush3.msra.mxu1 %v841_v21 }
 0x4fc   :  { %1593 = vmatprep.subr.mxu1 %v840_v22 }
 0x4fd   :  { %1594 = vmatpush3.msra.mxu1 %v840_v22 }
 0x4fe   :  { %1595 = vmatprep.subr.mxu1 %v839_v23 }
 0x4ff   :  { %1596 = vmatpush3.msra.mxu1 %v839_v23 }
 0x500   :  { %1597 = vmatprep.subr.mxu1 %v838_v24 }
 0x501   :  { %1598 = vmatpush3.msra.mxu1 %v838_v24 }
 0x502   :  { %1599 = vmatprep.subr.mxu1 %v837_v25 }
 0x503   :  { %1600 = vmatpush3.msra.mxu1 %v837_v25 }
 0x504   :  { %1601 = vmatprep.subr.mxu1 %v836_v26 }
 0x505   :  { %1602 = vmatpush3.msra.mxu1 %v836_v26 }
 0x506   :  { %1603 = vmatprep.subr.mxu1 %v835_v27 }
 0x507   :  { %1604 = vmatpush3.msra.mxu1 %v835_v27 }
 0x508   :  { %1605 = vmatprep.subr.mxu1 %v834_v28 }
 0x509   :  { %1606 = vmatpush3.msra.mxu1 %v834_v28 }
 0x50a   :  { %1607 = vmatprep.subr.mxu1 %v833_v29 }
 0x50b   :  { %1608 = vmatpush3.msra.mxu1 %v833_v29 }
 0x50c   :  { %1609 = vmatprep.subr.mxu1 %v832_v30 }
 0x50d   :  { %1610 = vmatpush3.msra.mxu1 %v832_v30 }
 0x5ae   :  { %v1543_v2 = vpop.f32.mrf.mxu1 }
 0x5af   :  { %v687_v3 = vadd.f32 %v1543_v2, %v1249_v1 }
 0x5b0   :  { %v681_v4 = vpop.f32.mrf.mxu1 }
 0x5b1   :  { %v682_v5 = vadd.f32 %v1249_v1, %v681_v4  ;;  %v691_v7 = vmax.f32 %v687_v3, 0.0  ;;  %v987_v4 = vld [vmem:[#allocation14 + $0x78] sm:$0xff] }
 0x5b2   :  { %1614 = vmatprep.subr.mxu0 %v987_v4 }
 0x5b3   :  { %v690_v6 = vmax.f32 %v682_v5, 0.0  ;;  %v986_v5 = vld [vmem:[#allocation14 + $0x70] sm:$0xff] }
 0x5b5   :  { %1576 = vmatprep.mubr.f32.mxu0 %v690_v6  ;;  %v985_v6 = vld [vmem:[#allocation14 + $0x68] sm:$0xff] }
 0x5b6   :  { %1577 = vmatmul.mubr.f32.vlgmr.msra.gmra.mxu0 %v691_v7  ;;  %v984_v7 = vld [vmem:[#allocation14 + $0x60] sm:$0xff] }
 0x5b7   :  { %1615 = vmatpush3.msra.mxu0 %v987_v4  ;;  %v1116_v4 = vld [vmem:[#allocation16 + $0x20] sm:$0xff] }
 0x5b8   :  { %1616 = vmatprep.subr.mxu0 %v986_v5 }
 0x5b9   :  { %1617 = vmatpush3.msra.mxu0 %v986_v5  ;;  %v1115_v5 = vld [vmem:[#allocation16 + $0x18] sm:$0xff] }
 0x5ba   :  { %1618 = vmatprep.subr.mxu0 %v985_v6 }
 0x5bb   :  { %1619 = vmatpush3.msra.mxu0 %v985_v6  ;;  %v1114_v6 = vld [vmem:[#allocation16 + $0x10] sm:$0xff] }
 0x5bc   :  { %1620 = vmatprep.subr.mxu0 %v984_v7 }
 0x5bd   :  { %1621 = vmatpush3.msra.mxu0 %v984_v7  ;;  %v1113_v7 = vld [vmem:[#allocation16 + $0x8] sm:$0xff] }
 0x676   :  { %v1578_v9 = vpop.f32.mrf.mxu0 }
 0x677   :  { %v2123_v10 = vadd.f32 %v1578_v9, %v1250_v8  ;;  %v982_v9 = vld [vmem:[#allocation14 + $0x50] sm:$0xff] }
 0x678   :  { %v779_v11 = vpop.f32.mrf.mxu0 }
 0x679   :  { %v2125_v12 = vadd.f32 %v1250_v8, %v779_v11  ;;  %792 = vadd.xlane.f32.xlu1 %v2123_v10  ;;  %v795_v13 = vmul.f32 %v2123_v10, %v2123_v10  ;;  %v983_v8 = vld [vmem:[#allocation14 + $0x58] sm:$0xff]  ;;  %v980_v11 = vld [vmem:[#allocation14 + $0x40] sm:$0xff] }
 0x67a   :  { %1622 = vmatprep.subr.mxu0 %v983_v8 }
 0x67b   :  { %790 = vadd.xlane.f32.xlu0 %v2125_v12  ;;  %v794_v14 = vmul.f32 %v2125_v12, %v2125_v12  ;;  %1623 = vmatpush3.msra.mxu0 %v983_v8  ;;  %v1112_v8 = vld [vmem:[#allocation16] sm:$0xff] }
 0x67c   :  { %1624 = vmatprep.subr.mxu0 %v982_v9 }
 0x67d   :  { %798 = vadd.xlane.f32.xlu1 %v795_v13  ;;  %1625 = vmatpush3.msra.mxu0 %v982_v9  ;;  %v978_v13 = vld [vmem:[#allocation14 + $0x30] sm:$0xff] }
 0x67f   :  { %796 = vadd.xlane.f32.xlu0 %v794_v14  ;;  %v977_v14 = vld [vmem:[#allocation14 + $0x28] sm:$0xff] }
 0x702   :  { %v793_v31 = vpop.xlane.xlu1 %792 }
 0x703   :  { %v801_v32 = vmul.f32 0.0078125, %v793_v31 }
 0x704   :  { %v791_v33 = vpop.xlane.xlu0 %790 }
 0x705   :  { %v800_v34 = vmul.f32 0.0078125, %v791_v33  ;;  %v805_v36 = vmul.f32 %v801_v32, %v801_v32  ;;  %v815_v47 = vsub.f32 %v2123_v10, %v801_v32  ;;  %v981_v10 = vld [vmem:[#allocation14 + $0x48] sm:$0xff] }
 0x706   :  { %v799_v35 = vpop.xlane.xlu1 %798  ;;  %1626 = vmatprep.subr.mxu0 %v981_v10 }
 0x707   :  { %v803_v37 = vmul.f32 0.0078125, %v799_v35  ;;  %v804_v39 = vmul.f32 %v800_v34, %v800_v34  ;;  %v814_v50 = vsub.f32 %v2125_v12, %v800_v34  ;;  %1627 = vmatpush3.msra.mxu0 %v981_v10  ;;  %v979_v12 = vld [vmem:[#allocation14 + $0x38] sm:$0xff] }
 0x708   :  { %v797_v38 = vpop.xlane.xlu0 %796  ;;  %1628 = vmatprep.subr.mxu0 %v980_v11 }
 0x709   :  { %v807_v40 = vsub.f32 %v803_v37, %v805_v36  ;;  %v802_v41 = vmul.f32 0.0078125, %v797_v38  ;;  %1629 = vmatpush3.msra.mxu0 %v980_v11  ;;  %v1254_v38 = vld [vmem:[#allocation17 + $0xe] ss:$0 sm:$0xff] }
 0x70a   :  { %1630 = vmatprep.subr.mxu0 %v979_v12 }
 0x70b   :  { %v809_v42 = vmax.f32 %v807_v40, 0.0  ;;  %v806_v43 = vsub.f32 %v802_v41, %v804_v39  ;;  %1631 = vmatpush3.msra.mxu0 %v979_v12 }
 0x70c   :  { %1632 = vmatprep.subr.mxu0 %v978_v13 }
 0x70d   :  { %v811_v44 = vadd.f32 1e-05, %v809_v42  ;;  %v808_v45 = vmax.f32 %v806_v43, 0.0  ;;  %1633 = vmatpush3.msra.mxu0 %v978_v13  ;;  %v1255_v42 = vld [vmem:[#allocation17 + $0xf] ss:$0 sm:$0xff] }
 0x70e   :  { %1634 = vmatprep.subr.mxu0 %v977_v14 }
 0x70f   :  { %1709 = vrsqrt.f32 %v811_v44  ;;  %v810_v46 = vadd.f32 1e-05, %v808_v45  ;;  %1635 = vmatpush3.msra.mxu0 %v977_v14 }
 0x710   :  { %1636 = vmatprep.subr.mxu0 %v976_v15 }
 0x711   :  { %1711 = vrsqrt.f32 %v810_v46  ;;  %1637 = vmatpush3.msra.mxu0 %v976_v15 }
 0x712   :  { %1638 = vmatprep.subr.mxu0 %v975_v16 }
 0x713   :  { %1639 = vmatpush3.msra.mxu0 %v975_v16 }
 0x714   :  { %1640 = vmatprep.subr.mxu0 %v974_v17 }
 0x715   :  { %1641 = vmatpush3.msra.mxu0 %v974_v17 }
 0x716   :  { %1642 = vmatprep.subr.mxu0 %v973_v18 }
 0x717   :  { %1643 = vmatpush3.msra.mxu0 %v973_v18 }
 0x718   :  { %1644 = vmatprep.subr.mxu0 %v972_v19 }
 0x719   :  { %1645 = vmatpush3.msra.mxu0 %v972_v19 }
 0x71c   :  { %v1710_v48 = vpop.eup %1709 }
 0x71d   :  { %v817_v51 = vmul.f32 %v1710_v48, %v815_v47 }
 0x71e   :  { %v1712_v52 = vpop.eup %1711 }
 0x71f   :  { %v816_v54 = vmul.f32 %v1712_v52, %v814_v50  ;;  %v823_v55 = vmul.f32 %v1251_v49, %v817_v51  ;;  %v1256_v50 = vld [vmem:[#allocation17 + $0x10] ss:$0 sm:$0xff] }
 0x721   :  { %v822_v56 = vmul.f32 %v1251_v49, %v816_v54  ;;  %v829_v57 = vadd.f32 %v1252_v53, %v823_v55 }
 0x723   :  { %v828_v58 = vadd.f32 %v1252_v53, %v822_v56  ;;  %v831_v60 = vmax.f32 %v829_v57, 0.0  ;;  %v1127_v57 = vld [vmem:[#allocation16 + $0x78] sm:$0xff] }
 0x724   :  { %1649 = vmatprep.subr.mxu1 %v1127_v57 }
 0x725   :  { %v830_v59 = vmax.f32 %v828_v58, 0.0  ;;  %v1126_v58 = vld [vmem:[#allocation16 + $0x70] sm:$0xff] }
 0x727   :  { %1611 = vmatprep.mubr.f32.mxu1 %v830_v59  ;;  %v1125_v59 = vld [vmem:[#allocation16 + $0x68] sm:$0xff] }
 0x728   :  { %1612 = vmatmul.mubr.f32.vlgmr.msra.gmra.mxu1 %v831_v60  ;;  %v1124_v60 = vld [vmem:[#allocation16 + $0x60] sm:$0xff] }
 0x729   :  { %1650 = vmatpush3.msra.mxu1 %v1127_v57 }
 0x72a   :  { %1651 = vmatprep.subr.mxu1 %v1126_v58 }
 0x72b   :  { %1652 = vmatpush3.msra.mxu1 %v1126_v58 }
 0x72c   :  { %1653 = vmatprep.subr.mxu1 %v1125_v59 }
 0x72d   :  { %1654 = vmatpush3.msra.mxu1 %v1125_v59 }
 0x72e   :  { %1655 = vmatprep.subr.mxu1 %v1124_v60 }
 0x72f   :  { %1656 = vmatpush3.msra.mxu1 %v1124_v60 }
 0x7e8   :  { %v1613_v62 = vpop.f32.mrf.mxu1 }
 0x7e9   :  { %v2135_v63 = vadd.f32 %v1613_v62, %v1253_v61  ;;  %v1122_v62 = vld [vmem:[#allocation16 + $0x50] sm:$0xff] }
 0x7ea   :  { %v919_v0 = vpop.f32.mrf.mxu1 }
 0x7eb   :  { %v2137_v1 = vadd.f32 %v1253_v61, %v919_v0  ;;  %932 = vadd.xlane.f32.xlu1 %v2135_v63  ;;  %v935_v2 = vmul.f32 %v2135_v63, %v2135_v63  ;;  %v1123_v61 = vld [vmem:[#allocation16 + $0x58] sm:$0xff]  ;;  %v1120_v0 = vld [vmem:[#allocation16 + $0x40] sm:$0xff] }
 0x7ec   :  { %1657 = vmatprep.subr.mxu1 %v1123_v61 }
 0x7ed   :  { %930 = vadd.xlane.f32.xlu0 %v2137_v1  ;;  %v934_v3 = vmul.f32 %v2137_v1, %v2137_v1  ;;  %1658 = vmatpush3.msra.mxu1 %v1123_v61 }
 0x7ee   :  { %1659 = vmatprep.subr.mxu1 %v1122_v62 }
 0x7ef   :  { %938 = vadd.xlane.f32.xlu1 %v935_v2  ;;  %1660 = vmatpush3.msra.mxu1 %v1122_v62  ;;  %v1118_v2 = vld [vmem:[#allocation16 + $0x30] sm:$0xff] }
 0x7f1   :  { %936 = vadd.xlane.f32.xlu0 %v934_v3  ;;  %v1117_v3 = vld [vmem:[#allocation16 + $0x28] sm:$0xff] }
 0x874   :  { %v933_v20 = vpop.xlane.xlu1 %932 }
 0x875   :  { %v941_v21 = vmul.f32 0.015625, %v933_v20 }
 0x876   :  { %v931_v22 = vpop.xlane.xlu0 %930 }
 0x877   :  { %v940_v23 = vmul.f32 0.015625, %v931_v22  ;;  %v945_v25 = vmul.f32 %v941_v21, %v941_v21  ;;  %v955_v36 = vsub.f32 %v2135_v63, %v941_v21  ;;  %v1121_v63 = vld [vmem:[#allocation16 + $0x48] sm:$0xff] }
 0x878   :  { %v939_v24 = vpop.xlane.xlu1 %938  ;;  %1661 = vmatprep.subr.mxu1 %v1121_v63 }
 0x879   :  { %v943_v26 = vmul.f32 0.015625, %v939_v24  ;;  %v944_v28 = vmul.f32 %v940_v23, %v940_v23  ;;  %v954_v39 = vsub.f32 %v2137_v1, %v940_v23  ;;  %1662 = vmatpush3.msra.mxu1 %v1121_v63  ;;  %v1119_v1 = vld [vmem:[#allocation16 + $0x38] sm:$0xff] }
 0x87a   :  { %v937_v27 = vpop.xlane.xlu0 %936  ;;  %1663 = vmatprep.subr.mxu1 %v1120_v0 }
 0x87b   :  { %v947_v29 = vsub.f32 %v943_v26, %v945_v25  ;;  %v942_v30 = vmul.f32 0.015625, %v937_v27  ;;  %1664 = vmatpush3.msra.mxu1 %v1120_v0  ;;  %v1257_v27 = vld [vmem:[#allocation17 + $0x11] ss:$0 sm:$0xff] }
 0x87c   :  { %1665 = vmatprep.subr.mxu1 %v1119_v1 }
 0x87d   :  { %v949_v31 = vmax.f32 %v947_v29, 0.0  ;;  %v946_v32 = vsub.f32 %v942_v30, %v944_v28  ;;  %1666 = vmatpush3.msra.mxu1 %v1119_v1 }
 0x87e   :  { %1667 = vmatprep.subr.mxu1 %v1118_v2 }
 0x87f   :  { %v951_v33 = vadd.f32 1e-05, %v949_v31  ;;  %v948_v34 = vmax.f32 %v946_v32, 0.0  ;;  %1668 = vmatpush3.msra.mxu1 %v1118_v2  ;;  %v1258_v31 = vld [vmem:[#allocation17 + $0x12] ss:$0 sm:$0xff] }
 0x880   :  { %1669 = vmatprep.subr.mxu1 %v1117_v3 }
 0x881   :  { %1713 = vrsqrt.f32 %v951_v33  ;;  %v950_v35 = vadd.f32 1e-05, %v948_v34  ;;  %1670 = vmatpush3.msra.mxu1 %v1117_v3 }
 0x882   :  { %1671 = vmatprep.subr.mxu1 %v1116_v4 }
 0x883   :  { %1715 = vrsqrt.f32 %v950_v35  ;;  %1672 = vmatpush3.msra.mxu1 %v1116_v4 }
 0x884   :  { %1673 = vmatprep.subr.mxu1 %v1115_v5 }
 0x885   :  { %1674 = vmatpush3.msra.mxu1 %v1115_v5 }
 0x886   :  { %1675 = vmatprep.subr.mxu1 %v1114_v6 }
 0x887   :  { %1676 = vmatpush3.msra.mxu1 %v1114_v6 }
 0x888   :  { %1677 = vmatprep.subr.mxu1 %v1113_v7 }
 0x889   :  { %1678 = vmatpush3.msra.mxu1 %v1113_v7 }
 0x88a   :  { %1679 = vmatprep.subr.mxu1 %v1112_v8 }
 0x88b   :  { %1680 = vmatpush3.msra.mxu1 %v1112_v8 }
 0x88e   :  { %v1714_v37 = vpop.eup %1713 }
 0x88f   :  { %v957_v40 = vmul.f32 %v1714_v37, %v955_v36 }
 0x890   :  { %v1716_v41 = vpop.eup %1715 }
 0x891   :  { %v956_v43 = vmul.f32 %v1716_v41, %v954_v39  ;;  %v963_v44 = vmul.f32 %v1254_v38, %v957_v40  ;;  %v1259_v39 = vld [vmem:[#allocation17 + $0x13] ss:$0 sm:$0xff] }
 0x893   :  { %v962_v45 = vmul.f32 %v1254_v38, %v956_v43  ;;  %v969_v46 = vadd.f32 %v1255_v42, %v963_v44 }
 0x895   :  { %v968_v47 = vadd.f32 %v1255_v42, %v962_v45  ;;  %v971_v49 = vmax.f32 %v969_v46, 0.0 }
 0x897   :  { %v970_v48 = vmax.f32 %v968_v47, 0.0 }
 0x899   :  { %1646 = vmatprep.mubr.f32.mxu0 %v970_v48 }
 0x89a   :  { %1647 = vmatmul.mubr.f32.vlgmr.msra.gmra.mxu0 %v971_v49 }
 0x95a   :  { %v1648_v51 = vpop.f32.mrf.mxu0 }
 0x95b   :  { %v2147_v52 = vadd.f32 %v1648_v51, %v1256_v50 }
 0x95c   :  { %v1059_v53 = vpop.f32.mrf.mxu0 }
 0x95d   :  { %v2149_v54 = vadd.f32 %v1256_v50, %v1059_v53  ;;  %1072 = vadd.xlane.f32.xlu1 %v2147_v52  ;;  %v1075_v55 = vmul.f32 %v2147_v52, %v2147_v52 }
 0x95f   :  { %1070 = vadd.xlane.f32.xlu0 %v2149_v54  ;;  %v1074_v56 = vmul.f32 %v2149_v54, %v2149_v54 }
 0x961   :  { %1078 = vadd.xlane.f32.xlu1 %v1075_v55 }
 0x963   :  { %1076 = vadd.xlane.f32.xlu0 %v1074_v56 }
 0x9e6   :  { %v1073_v9 = vpop.xlane.xlu1 %1072 }
 0x9e7   :  { %v1081_v10 = vmul.f32 0.03125, %v1073_v9 }
 0x9e8   :  { %v1071_v11 = vpop.xlane.xlu0 %1070 }
 0x9e9   :  { %v1080_v12 = vmul.f32 0.03125, %v1071_v11  ;;  %v1085_v14 = vmul.f32 %v1081_v10, %v1081_v10  ;;  %v1095_v25 = vsub.f32 %v2147_v52, %v1081_v10 }
 0x9ea   :  { %v1079_v13 = vpop.xlane.xlu1 %1078 }
 0x9eb   :  { %v1083_v15 = vmul.f32 0.03125, %v1079_v13  ;;  %v1084_v17 = vmul.f32 %v1080_v12, %v1080_v12  ;;  %v1094_v28 = vsub.f32 %v2149_v54, %v1080_v12 }
 0x9ec   :  { %v1077_v16 = vpop.xlane.xlu0 %1076 }
 0x9ed   :  { %v1087_v18 = vsub.f32 %v1083_v15, %v1085_v14  ;;  %v1082_v19 = vmul.f32 0.03125, %v1077_v16 }
 0x9ef   :  { %v1089_v20 = vmax.f32 %v1087_v18, 0.0  ;;  %v1086_v21 = vsub.f32 %v1082_v19, %v1084_v17 }
 0x9f1   :  { %v1091_v22 = vadd.f32 1e-05, %v1089_v20  ;;  %v1088_v23 = vmax.f32 %v1086_v21, 0.0 }
 0x9f3   :  { %1717 = vrsqrt.f32 %v1091_v22  ;;  %v1090_v24 = vadd.f32 1e-05, %v1088_v23 }
 0x9f5   :  { %1719 = vrsqrt.f32 %v1090_v24 }
 0xa00   :  { %v1718_v26 = vpop.eup %1717 }
 0xa01   :  { %v1097_v29 = vmul.f32 %v1718_v26, %v1095_v25 }
 0xa02   :  { %v1720_v30 = vpop.eup %1719 }
 0xa03   :  { %v1096_v32 = vmul.f32 %v1720_v30, %v1094_v28  ;;  %v1103_v33 = vmul.f32 %v1257_v27, %v1097_v29 }
 0xa05   :  { %v1102_v34 = vmul.f32 %v1257_v27, %v1096_v32  ;;  %v1109_v35 = vadd.f32 %v1258_v31, %v1103_v33 }
 0xa07   :  { %v1108_v36 = vadd.f32 %v1258_v31, %v1102_v34  ;;  %v1111_v38 = vmax.f32 %v1109_v35, 0.0 }
 0xa09   :  { %v1110_v37 = vmax.f32 %v1108_v36, 0.0 }
 0xa0b   :  { %1681 = vmatprep.mubr.f32.mxu1 %v1110_v37 }
 0xa0c   :  { %1682 = vmatmul.mubr.f32.vlgmr.msra.gmra.mxu1 %v1111_v38 }
 0xacc   :  { %v1683_v40 = vpop.f32.mrf.mxu1 }
 0xacd   :  { %v1205_v41 = vadd.f32 %v1683_v40, %v1259_v39 }
 0xace   :  { %v1199_v42 = vpop.f32.mrf.mxu1 }
 0xacf   :  { %v1209_v43 = vmul.f32 0.5, %v1205_v41  ;;  %v1200_v44 = vadd.f32 %v1259_v39, %v1199_v42 }
 0xad1   :  { %1721 = vtanh.f32 %v1209_v43  ;;  %v1208_v45 = vmul.f32 0.5, %v1200_v44 }
 0xad3   :  { %1723 = vtanh.f32 %v1208_v45 }
 0xade   :  { %v1722_v46 = vpop.eup %1721 }
 0xadf   :  { %v1213_v47 = vmul.f32 0.5, %v1722_v46 }
 0xae0   :  { %v1724_v48 = vpop.eup %1723 }
 0xae1   :  { %v1212_v49 = vmul.f32 0.5, %v1724_v48  ;;  %v1215_v50 = vadd.f32 0.5, %v1213_v47 }
 0xae3   :  { %v1214_v51 = vadd.f32 0.5, %v1212_v49  ;;  %1217 = vst [vmem:[#allocation19 + $0x8] sm:$0xff] %v1215_v50 }
 0xae5   :  { %1216 = vst [vmem:[#allocation19] sm:$0xff] %v1214_v51 }
 0xae6   :  { %1936 = shalt.err (!%p1933_p12)
}
 0xae7   :  { %1229 = dma.vmem_to_hbm [thread:$0]  %s1224_s9, 256, %s2175_s10, [#allocation4], %s1961_s18, %s1961_s18, %s1962_s19  }
 0xae8   :  { %1957 = dma.done.wait [#allocation4], 256  }
 0xae9   :  { %1958 = vsyncadd [#allocation4], 4294967040 }
 0xaea   :  { %1233 = vsyncpa [#allocation3], 1 }
 0xaeb   :  { %1234 = vsyncpa [#allocation6], 1 }
 0xaec   :  { %1235 = vsyncpa [#allocation9], 1 }
 0xaed   :  { %1236 = vsyncpa [#allocation12], 1 }
 0xaee   :  { %1237 = vsyncpa [#allocation15], 1 }
 0xaef   :  { %1238 = vsyncpa [#allocation18], 1 }
 0xaf0   :  { %1239 = vsyncpa [#allocation4], 1 }

</bundles_post_ra>
